<compile_context>
chip_gen: v6e
topology: v6e:2x2x1
jax: 0.10.0
libtpu: 0.0.40
codegen_flags: <defaults>
</compile_context>

<pallas_src>
import jax
import jax.numpy as jnp
from jax.experimental import pallas as pl
from jax.experimental.pallas import tpu as pltpu

HP = 128            # lane-slab width (padded embedding / decoder output lanes)
NUM_CLASSES = 8


# ---------------------------------------------------------------- fused kernel
def _make_birnn_kernel(num_layers, T, B, H):
    GP = 4 * H          # packed per-direction gate slab [i|f|o|g] (H=32 -> 128)

    def kernel(x_ref, w_ih_ref, w_hh_ref, b_ref, dec_w_ref, dec_b_ref,
               out_ref, proj, buf):
        l = pl.program_id(0)

        # ---- batched input->gates projection for all T steps & both directions
        # (one MXU matmul per layer; bias folded in once).
        @pl.when(l == 0)
        def _():
            proj[...] = (jnp.dot(x_ref[...], w_ih_ref[...],
                                 preferred_element_type=jnp.float32)
                         + b_ref[...])

        @pl.when(l > 0)
        def _():
            proj[...] = (jnp.dot(buf[...].astype(jnp.bfloat16),
                                 w_ih_ref[0:2 * H, :],
                                 preferred_element_type=jnp.float32)
                         + b_ref[...])

        # ---- fused fwd+bwd recurrence, fully unrolled over T ------------------
        h_f = jnp.zeros((B, H), jnp.float32)
        h_b = jnp.zeros((B, H), jnp.float32)
        c_f = jnp.zeros((B, H), jnp.float32)
        c_b = jnp.zeros((B, H), jnp.float32)

        def cell(slab, c):
            # slab: (B, GP) pre-activations, gate order [i|f|o|g] (32 lanes each)
            sig = jax.nn.sigmoid(slab[:, 0:3 * H])      # one contiguous EUP op
            i = sig[:, 0:H]
            f = sig[:, H:2 * H]
            o = sig[:, 2 * H:3 * H]
            g = jnp.tanh(slab[:, 3 * H:4 * H])
            c = f * c + i * g
            return o * jnp.tanh(c), c

        for s in range(T):
            rf = s * B                  # forward direction processes time s
            rb = (T - 1 - s) * B        # backward direction processes time T-1-s
            gin = jnp.concatenate(
                [proj[rf:rf + B, 0:GP], proj[rb:rb + B, GP:2 * GP]], axis=1)
            h_cat = jnp.concatenate([h_f, h_b], axis=1).astype(jnp.bfloat16)
            # Single block-diagonal recurrent matmul for BOTH directions
            # (K = 2H, N = 2*GP); W_hh read from VMEM so Mosaic folds the operand.
            gates = gin + jnp.dot(h_cat, w_hh_ref[...],
                                  preferred_element_type=jnp.float32)
            h_f, c_f = cell(gates[:, 0:GP], c_f)
            h_b, c_b = cell(gates[:, GP:2 * GP], c_b)
            buf[rf:rf + B, 0:H] = h_f
            buf[rb:rb + B, H:2 * H] = h_b

        # ---- decoder (top layer only): cat(out[0], out[-1]) @ W + b, softmax --
        @pl.when(l == num_layers - 1)
        def _():
            feat = jnp.concatenate(
                [buf[0:B, :], buf[(T - 1) * B:T * B, :]],
                axis=1).astype(jnp.bfloat16)                       # (B, 4H)
            logits = (jnp.dot(feat, dec_w_ref[...],
                              preferred_element_type=jnp.float32)
                      + dec_b_ref[...])             # (B, HP); pad lanes = -1e30
            m = jnp.max(logits, axis=-1, keepdims=True)
            e = jnp.exp(logits - m)                 # pad lanes underflow to 0
            out_ref[...] = e * pl.reciprocal(
                jnp.sum(e, axis=-1, keepdims=True), approx=True)

    return kernel


# ---------------------------------------------------------------- host wrapper
def birnn_forward(x, packed):
    """x: (T, B, E) float32 -> class probabilities (B, 8)."""
    T, B, E = x.shape
    L = packed["w_ih"].shape[0]
    H = packed["w_hh"].shape[1] // 2
    GP = 4 * H

    # Pad embedding lanes to a full vreg and flatten (T, B): one lane-dense
    # (T*B, 128) bf16 slab.
    x_p = jnp.zeros((T * B, HP), jnp.float32).at[:, :E].set(
        x.reshape(T * B, E)).astype(jnp.bfloat16)

    out = pl.pallas_call(
        _make_birnn_kernel(L, T, B, H),
        out_shape=jax.ShapeDtypeStruct((B, HP), jnp.float32),
        grid=(L,),
        in_specs=[
            pl.BlockSpec((T * B, HP), lambda l: (0, 0)),              # x
            pl.BlockSpec((None, HP, 2 * GP), lambda l: (l, 0, 0)),    # w_ih (L,128,2GP)
            pl.BlockSpec((None, 2 * H, 2 * GP), lambda l: (l, 0, 0)),  # w_hh (L,2H,2GP)
            pl.BlockSpec((None, 1, 2 * GP), lambda l: (l, 0, 0)),     # bias (L,1,2GP)
            pl.BlockSpec((4 * H, HP), lambda l: (0, 0)),              # dec_w
            pl.BlockSpec((1, HP), lambda l: (0, 0)),                  # dec_b
        ],
        out_specs=pl.BlockSpec((B, HP), lambda l: (0, 0)),
        scratch_shapes=[
            pltpu.VMEM((T * B, 2 * GP), jnp.float32),   # proj: input->gates, both dirs
            pltpu.VMEM((T * B, 2 * H), jnp.float32),    # layer outputs [fwd|bwd]
        ],
        compiler_params=pltpu.CompilerParams(
            dimension_semantics=("arbitrary",)),
    )(x_p, packed["w_ih"], packed["w_hh"], packed["b"],
      packed["dec_w"], packed["dec_b"])
    return out[:, :NUM_CLASSES]


# ------------------------------------------------------------ params & packing
def init_params(key, embed_size, num_hiddens, num_layers):
    """PyTorch-style U(-1/sqrt(H), 1/sqrt(H)) init, math ("x @ W") layout,
    gate order [i, f, g, o] (as nn.LSTM)."""
    scale = 1.0 / float(num_hiddens) ** 0.5
    params = {"layers": [], "num_hiddens": num_hiddens, "embed_size": embed_size}
    for layer in range(num_layers):
        d_in = embed_size if layer == 0 else 2 * num_hiddens
        layer_p = {}
        for direction in ("fwd", "bwd"):
            key, k1, k2, k3, k4 = jax.random.split(key, 5)
            w_ih = jax.random.uniform(k1, (d_in, 4 * num_hiddens), jnp.float32, -scale, scale)
            w_hh = jax.random.uniform(k2, (num_hiddens, 4 * num_hiddens), jnp.float32, -scale, scale)
            b_ih = jax.random.uniform(k3, (4 * num_hiddens,), jnp.float32, -scale, scale)
            b_hh = jax.random.uniform(k4, (4 * num_hiddens,), jnp.float32, -scale, scale)
            layer_p[direction] = (w_ih, w_hh, b_ih + b_hh)
        params["layers"].append(layer_p)
    key, k1, k2 = jax.random.split(key, 3)
    params["dec_w"] = jax.random.uniform(k1, (2 * 2 * num_hiddens, NUM_CLASSES),
                                         jnp.float32, -scale, scale)
    params["dec_b"] = jax.random.uniform(k2, (NUM_CLASSES,), jnp.float32, -scale, scale)
    return params


def _reorder_gates(w, H):
    """(rows, 4H) gate order [i,f,g,o] -> packed kernel order [i,f,o,g]."""
    return jnp.concatenate(
        [w[:, 0:H], w[:, H:2 * H], w[:, 3 * H:4 * H], w[:, 2 * H:3 * H]], axis=1)


def pack_params(params):
    """Stack / pad raw params into the kernel's lane-aligned bf16 layout."""
    H = params["num_hiddens"]
    GP = 4 * H
    w_ih_list, w_hh_list, b_list = [], [], []
    for lp in params["layers"]:
        w_ih_l = jnp.zeros((HP, 2 * GP), jnp.float32)
        w_hh_l = jnp.zeros((2 * H, 2 * GP), jnp.float32)
        b_l = jnp.zeros((1, 2 * GP), jnp.float32)
        for d, direction in enumerate(("fwd", "bwd")):
            w_ih, w_hh, b = lp[direction]
            w_ih_r = _reorder_gates(w_ih, H)                     # (d_in, GP)
            w_hh_r = _reorder_gates(w_hh, H)                     # (H,   GP)
            b_r = _reorder_gates(b.reshape(1, -1), H)[0]         # (GP,)
            col = d * GP
            w_ih_l = w_ih_l.at[0:w_ih_r.shape[0], col:col + GP].set(w_ih_r)
            # block-diagonal recurrent weight: fwd h rows -> fwd gate cols, etc.
            w_hh_l = w_hh_l.at[d * H:(d + 1) * H, col:col + GP].set(w_hh_r)
            b_l = b_l.at[0, col:col + GP].set(b_r)
        w_ih_list.append(w_ih_l)
        w_hh_list.append(w_hh_l)
        b_list.append(b_l)
    packed = {
        "w_ih": jnp.stack(w_ih_list).astype(jnp.bfloat16),   # (L, 128, 2*GP)
        "w_hh": jnp.stack(w_hh_list).astype(jnp.bfloat16),   # (L, 2H,  2*GP)
        "b": jnp.stack(b_list),                              # (L, 1,   2*GP) f32
    }
    # Decoder: feature layout [fwd[0] | bwd[0] | fwd[-1] | bwd[-1]] = raw row
    # order of dec_w.  Output columns padded to a full vreg (8 real classes,
    # padded bias lanes = -1e30 so softmax ignores them; decoder math stays f32
    # post-matmul so the pad lanes underflow to 0 instead of NaN-ing).
    dec_w, dec_b = params["dec_w"], params["dec_b"]
    dec_w_p = jnp.zeros((4 * H, HP), jnp.float32).at[:, :NUM_CLASSES].set(dec_w)
    dec_b_p = jnp.full((1, HP), -1e30, jnp.float32).at[0, :NUM_CLASSES].set(dec_b)
    packed["dec_w"] = dec_w_p.astype(jnp.bfloat16)
    packed["dec_b"] = dec_b_p
    return packed


# ------------------------------------------------------------ pure-JAX reference
def birnn_reference(x, params):
    H = params["num_hiddens"]

    def lstm_dir(seq, w_ih, w_hh, b):
        T, B, _ = seq.shape
        h = jnp.zeros((B, H), jnp.float32)
        c = jnp.zeros((B, H), jnp.float32)
        outs = []
        for t in range(T):
            gates = seq[t] @ w_ih + h @ w_hh + b
            i = jax.nn.sigmoid(gates[:, 0 * H:1 * H])
            f = jax.nn.sigmoid(gates[:, 1 * H:2 * H])
            g = jnp.tanh(gates[:, 2 * H:3 * H])
            o = jax.nn.sigmoid(gates[:, 3 * H:4 * H])
            c = f * c + i * g
            h = o * jnp.tanh(c)
            outs.append(h)
        return jnp.stack(outs)

    h = x
    for lp in params["layers"]:
        of = lstm_dir(h, *lp["fwd"])
        ob = jnp.flip(lstm_dir(jnp.flip(h, 0), *lp["bwd"]), 0)
        h = jnp.concatenate([of, ob], axis=-1)
    feat = jnp.concatenate([h[0], h[-1]], axis=1)
    return jax.nn.softmax(feat @ params["dec_w"] + params["dec_b"], axis=-1)


# ------------------------------------------------------------------------ main
if __name__ == "__main__":
    embed_size, num_hiddens, num_layers = 16, 32, 2
    T, B = 8, 8

    key = jax.random.PRNGKey(0)
    kx, kp = jax.random.split(key)
    x = jax.random.normal(kx, (T, B, embed_size), dtype=jnp.float32)
    params = init_params(kp, embed_size, num_hiddens, num_layers)
    packed = pack_params(params)

    out = jax.jit(birnn_forward)(x, packed)
    out = jax.block_until_ready(out)

    assert out.shape == (B, NUM_CLASSES), out.shape
    assert bool(jnp.all(jnp.isfinite(out)))
    # approx=True reciprocal in the softmax -> rows sum to 1 within ~1e-3.
    assert bool(jnp.allclose(jnp.sum(out, axis=1), 1.0, atol=3e-3))

    ref = birnn_reference(x, params)
    # atol reflects bf16 weight quantization on the MXU path (not a kernel bug).
    assert bool(jnp.allclose(out, ref, atol=3e-2)), float(jnp.max(jnp.abs(out - ref)))

    print("KERNEL_OK")
</pallas_src>

<mosaic_0001>
module attributes {stable_mosaic.version = 11 : i64} {
  func.func @kernel(%arg0: i32, %arg1: memref<64x128xbf16, #tpu.memory_space<vmem>>, %arg2: memref<1x128x256xbf16, #tpu.memory_space<vmem>>, %arg3: memref<1x64x256xbf16, #tpu.memory_space<vmem>>, %arg4: memref<1x1x256xf32, #tpu.memory_space<vmem>>, %arg5: memref<128x128xbf16, #tpu.memory_space<vmem>>, %arg6: memref<1x128xf32, #tpu.memory_space<vmem>>, %arg7: memref<8x128xf32, #tpu.memory_space<vmem>>, %arg8: memref<64x256xf32, #tpu.memory_space<vmem>>, %arg9: memref<64x64xf32, #tpu.memory_space<vmem>>) attributes {dimension_semantics = [#tpu.dimension_semantics<arbitrary>], iteration_bounds = array<i64: 2>, scalar_prefetch = 0 : i64, scratch_operands = 2 : i64, tpu.core_type = #tpu.core_type<tc>, window_params = [{pipeline_mode = #tpu.pipeline_mode<synchronous>, transform_indices = @transform_0, window_bounds = array<i64: 64, 128>}, {transform_indices = @transform_1, window_bounds = array<i64: 1, 128, 256>}, {transform_indices = @transform_2, window_bounds = array<i64: 1, 64, 256>}, {transform_indices = @transform_3, window_bounds = array<i64: 1, 1, 256>}, {pipeline_mode = #tpu.pipeline_mode<synchronous>, transform_indices = @transform_4, window_bounds = array<i64: 128, 128>}, {pipeline_mode = #tpu.pipeline_mode<synchronous>, transform_indices = @transform_5, window_bounds = array<i64: 1, 128>}, {pipeline_mode = #tpu.pipeline_mode<synchronous>, transform_indices = @transform_6, window_bounds = array<i64: 8, 128>}]} {
    %c0_i32 = arith.constant 0 : i32
    %0 = arith.cmpi eq, %arg0, %c0_i32 : i32
    %1 = arith.extui %0 : i1 to i32
    %c0_i32_0 = arith.constant 0 : i32
    %2 = arith.cmpi ne, %1, %c0_i32_0 : i32
    scf.if %2 {
      %c0_110 = arith.constant 0 : index
      %c0_111 = arith.constant 0 : index
      %373 = vector.load %arg1[%c0_110, %c0_111] : memref<64x128xbf16, #tpu.memory_space<vmem>>, vector<64x128xbf16>
      %c0_112 = arith.constant 0 : index
      %c0_113 = arith.constant 0 : index
      %c0_114 = arith.constant 0 : index
      %374 = vector.load %arg2[%c0_112, %c0_113, %c0_114] : memref<1x128x256xbf16, #tpu.memory_space<vmem>>, vector<1x128x256xbf16>
      %375 = vector.shape_cast %374 : vector<1x128x256xbf16> to vector<128x256xbf16>
      %cst_115 = arith.constant dense<0.000000e+00> : vector<64x256xf32>
      %376 = tpu.matmul %373, %375, %cst_115 {dimension_numbers = #tpu.dot_dimension_numbers<[1], [0], [0], [1], [0, 0, 1, 1], [], []>} : vector<64x128xbf16>, vector<128x256xbf16>, vector<64x256xf32> -> vector<64x256xf32>
      %c0_116 = arith.constant 0 : index
      %c0_117 = arith.constant 0 : index
      %c0_118 = arith.constant 0 : index
      %377 = vector.load %arg4[%c0_116, %c0_117, %c0_118] : memref<1x1x256xf32, #tpu.memory_space<vmem>>, vector<1x1x256xf32>
      %378 = vector.shape_cast %377 : vector<1x1x256xf32> to vector<1x256xf32>
      %379 = vector.broadcast %378 : vector<1x256xf32> to vector<64x256xf32>
      %380 = arith.addf %376, %379 : vector<64x256xf32>
      %c0_119 = arith.constant 0 : index
      %c0_120 = arith.constant 0 : index
      %381 = vector.load %arg8[%c0_119, %c0_120] : memref<64x256xf32, #tpu.memory_space<vmem>>, vector<64x256xf32>
      tpu.vector_store %arg8[%c0_119, %c0_120], %380 {strides = array<i32>} : memref<64x256xf32, #tpu.memory_space<vmem>>, vector<64x256xf32>,
    } else {
    }
    %c0_i32_1 = arith.constant 0 : i32
    %3 = arith.cmpi sgt, %arg0, %c0_i32_1 : i32
    %4 = arith.extui %3 : i1 to i32
    %c0_i32_2 = arith.constant 0 : i32
    %5 = arith.cmpi ne, %4, %c0_i32_2 : i32
    scf.if %5 {
      %c0_110 = arith.constant 0 : index
      %c0_111 = arith.constant 0 : index
      %373 = vector.load %arg9[%c0_110, %c0_111] : memref<64x64xf32, #tpu.memory_space<vmem>>, vector<64x64xf32>
      %374 = arith.truncf %373 : vector<64x64xf32> to vector<64x64xbf16>
      %c0_112 = arith.constant 0 : index
      %c0_113 = arith.constant 0 : index
      %c0_114 = arith.constant 0 : index
      %375 = vector.load %arg2[%c0_112, %c0_113, %c0_114] : memref<1x128x256xbf16, #tpu.memory_space<vmem>>, vector<1x64x256xbf16>
      %376 = vector.shape_cast %375 : vector<1x64x256xbf16> to vector<64x256xbf16>
      %cst_115 = arith.constant dense<0.000000e+00> : vector<64x256xf32>
      %377 = tpu.matmul %374, %376, %cst_115 {dimension_numbers = #tpu.dot_dimension_numbers<[1], [0], [0], [1], [0, 0, 1, 1], [], []>} : vector<64x64xbf16>, vector<64x256xbf16>, vector<64x256xf32> -> vector<64x256xf32>
      %c0_116 = arith.constant 0 : index
      %c0_117 = arith.constant 0 : index
      %c0_118 = arith.constant 0 : index
      %378 = vector.load %arg4[%c0_116, %c0_117, %c0_118] : memref<1x1x256xf32, #tpu.memory_space<vmem>>, vector<1x1x256xf32>
      %379 = vector.shape_cast %378 : vector<1x1x256xf32> to vector<1x256xf32>
      %380 = vector.broadcast %379 : vector<1x256xf32> to vector<64x256xf32>
      %381 = arith.addf %377, %380 : vector<64x256xf32>
      %c0_119 = arith.constant 0 : index
      %c0_120 = arith.constant 0 : index
      %382 = vector.load %arg8[%c0_119, %c0_120] : memref<64x256xf32, #tpu.memory_space<vmem>>, vector<64x256xf32>
      tpu.vector_store %arg8[%c0_119, %c0_120], %381 {strides = array<i32>} : memref<64x256xf32, #tpu.memory_space<vmem>>, vector<64x256xf32>,
    } else {
    }
    %cst = arith.constant 0.000000e+00 : f32
    %6 = vector.broadcast %cst : f32 to vector<8x32xf32>
    %cst_3 = arith.constant 0.000000e+00 : f32
    %7 = vector.broadcast %cst_3 : f32 to vector<8x32xf32>
    %cst_4 = arith.constant 0.000000e+00 : f32
    %8 = vector.broadcast %cst_4 : f32 to vector<8x32xf32>
    %cst_5 = arith.constant 0.000000e+00 : f32
    %9 = vector.broadcast %cst_5 : f32 to vector<8x32xf32>
    %c0 = arith.constant 0 : index
    %c0_6 = arith.constant 0 : index
    %10 = vector.load %arg8[%c0, %c0_6] : memref<64x256xf32, #tpu.memory_space<vmem>>, vector<8x128xf32>
    %c56 = arith.constant 56 : index
    %c128 = arith.constant 128 : index
    %11 = vector.load %arg8[%c56, %c128] : memref<64x256xf32, #tpu.memory_space<vmem>>, vector<8x128xf32>
    %12 = tpu.concatenate %10, %11 in 1 : vector<8x128xf32>, vector<8x128xf32> -> vector<8x256xf32>
    %13 = tpu.concatenate %6, %7 in 1 : vector<8x32xf32>, vector<8x32xf32> -> vector<8x64xf32>
    %14 = arith.truncf %13 : vector<8x64xf32> to vector<8x64xbf16>
    %c0_7 = arith.constant 0 : index
    %c0_8 = arith.constant 0 : index
    %c0_9 = arith.constant 0 : index
    %15 = vector.load %arg3[%c0_7, %c0_8, %c0_9] : memref<1x64x256xbf16, #tpu.memory_space<vmem>>, vector<1x64x256xbf16>
    %16 = vector.shape_cast %15 : vector<1x64x256xbf16> to vector<64x256xbf16>
    %cst_10 = arith.constant dense<0.000000e+00> : vector<8x256xf32>
    %17 = tpu.matmul %14, %16, %cst_10 {dimension_numbers = #tpu.dot_dimension_numbers<[1], [0], [0], [1], [0, 0, 1, 1], [], []>} : vector<8x64xbf16>, vector<64x256xbf16>, vector<8x256xf32> -> vector<8x256xf32>
    %18 = arith.addf %12, %17 : vector<8x256xf32>
    %19 = vector.extract_strided_slice %18 {offsets = [0, 0], sizes = [8, 128], strides = [1, 1]} : vector<8x256xf32> to vector<8x128xf32>
    %20 = vector.extract_strided_slice %19 {offsets = [0, 0], sizes = [8, 96], strides = [1, 1]} : vector<8x128xf32> to vector<8x96xf32>
    %21 = arith.negf %20 : vector<8x96xf32>
    %22 = math.exp %21 : vector<8x96xf32>
    %cst_11 = arith.constant 1.000000e+00 : f32
    %23 = vector.broadcast %cst_11 : f32 to vector<8x96xf32>
    %24 = arith.addf %23, %22 : vector<8x96xf32>
    %25 = arith.divf %23, %24 : vector<8x96xf32>
    %26 = vector.extract_strided_slice %25 {offsets = [0, 0], sizes = [8, 32], strides = [1, 1]} : vector<8x96xf32> to vector<8x32xf32>
    %27 = vector.extract_strided_slice %25 {offsets = [0, 32], sizes = [8, 32], strides = [1, 1]} : vector<8x96xf32> to vector<8x32xf32>
    %28 = vector.extract_strided_slice %25 {offsets = [0, 64], sizes = [8, 32], strides = [1, 1]} : vector<8x96xf32> to vector<8x32xf32>
    %29 = vector.extract_strided_slice %19 {offsets = [0, 96], sizes = [8, 32], strides = [1, 1]} : vector<8x128xf32> to vector<8x32xf32>
    %30 = math.tanh %29 : vector<8x32xf32>
    %31 = arith.mulf %27, %8 : vector<8x32xf32>
    %32 = arith.mulf %26, %30 : vector<8x32xf32>
    %33 = arith.addf %31, %32 : vector<8x32xf32>
    %34 = math.tanh %33 : vector<8x32xf32>
    %35 = arith.mulf %28, %34 : vector<8x32xf32>
    %36 = vector.extract_strided_slice %18 {offsets = [0, 128], sizes = [8, 128], strides = [1, 1]} : vector<8x256xf32> to vector<8x128xf32>
    %37 = vector.extract_strided_slice %36 {offsets = [0, 0], sizes = [8, 96], strides = [1, 1]} : vector<8x128xf32> to vector<8x96xf32>
    %38 = arith.negf %37 : vector<8x96xf32>
    %39 = math.exp %38 : vector<8x96xf32>
    %cst_12 = arith.constant 1.000000e+00 : f32
    %40 = vector.broadcast %cst_12 : f32 to vector<8x96xf32>
    %41 = arith.addf %40, %39 : vector<8x96xf32>
    %42 = arith.divf %40, %41 : vector<8x96xf32>
    %43 = vector.extract_strided_slice %42 {offsets = [0, 0], sizes = [8, 32], strides = [1, 1]} : vector<8x96xf32> to vector<8x32xf32>
    %44 = vector.extract_strided_slice %42 {offsets = [0, 32], sizes = [8, 32], strides = [1, 1]} : vector<8x96xf32> to vector<8x32xf32>
    %45 = vector.extract_strided_slice %42 {offsets = [0, 64], sizes = [8, 32], strides = [1, 1]} : vector<8x96xf32> to vector<8x32xf32>
    %46 = vector.extract_strided_slice %36 {offsets = [0, 96], sizes = [8, 32], strides = [1, 1]} : vector<8x128xf32> to vector<8x32xf32>
    %47 = math.tanh %46 : vector<8x32xf32>
    %48 = arith.mulf %44, %9 : vector<8x32xf32>
    %49 = arith.mulf %43, %47 : vector<8x32xf32>
    %50 = arith.addf %48, %49 : vector<8x32xf32>
    %51 = math.tanh %50 : vector<8x32xf32>
    %52 = arith.mulf %45, %51 : vector<8x32xf32>
    %c0_13 = arith.constant 0 : index
    %c0_14 = arith.constant 0 : index
    %53 = vector.load %arg9[%c0_13, %c0_14] : memref<64x64xf32, #tpu.memory_space<vmem>>, vector<8x32xf32>
    tpu.vector_store %arg9[%c0_13, %c0_14], %35 {strides = array<i32>} : memref<64x64xf32, #tpu.memory_space<vmem>>, vector<8x32xf32>,
    %c56_15 = arith.constant 56 : index
    %c32 = arith.constant 32 : index
    %54 = vector.load %arg9[%c56_15, %c32] : memref<64x64xf32, #tpu.memory_space<vmem>>, vector<8x32xf32>
    tpu.vector_store %arg9[%c56_15, %c32], %52 {strides = array<i32>} : memref<64x64xf32, #tpu.memory_space<vmem>>, vector<8x32xf32>,
    %c8 = arith.constant 8 : index
    %c0_16 = arith.constant 0 : index
    %55 = vector.load %arg8[%c8, %c0_16] : memref<64x256xf32, #tpu.memory_space<vmem>>, vector<8x128xf32>
    %c48 = arith.constant 48 : index
    %c128_17 = arith.constant 128 : index
    %56 = vector.load %arg8[%c48, %c128_17] : memref<64x256xf32, #tpu.memory_space<vmem>>, vector<8x128xf32>
    %57 = tpu.concatenate %55, %56 in 1 : vector<8x128xf32>, vector<8x128xf32> -> vector<8x256xf32>
    %58 = tpu.concatenate %35, %52 in 1 : vector<8x32xf32>, vector<8x32xf32> -> vector<8x64xf32>
    %59 = arith.truncf %58 : vector<8x64xf32> to vector<8x64xbf16>
    %c0_18 = arith.constant 0 : index
    %c0_19 = arith.constant 0 : index
    %c0_20 = arith.constant 0 : index
    %60 = vector.load %arg3[%c0_18, %c0_19, %c0_20] : memref<1x64x256xbf16, #tpu.memory_space<vmem>>, vector<1x64x256xbf16>
    %61 = vector.shape_cast %60 : vector<1x64x256xbf16> to vector<64x256xbf16>
    %cst_21 = arith.constant dense<0.000000e+00> : vector<8x256xf32>
    %62 = tpu.matmul %59, %61, %cst_21 {dimension_numbers = #tpu.dot_dimension_numbers<[1], [0], [0], [1], [0, 0, 1, 1], [], []>} : vector<8x64xbf16>, vector<64x256xbf16>, vector<8x256xf32> -> vector<8x256xf32>
    %63 = arith.addf %57, %62 : vector<8x256xf32>
    %64 = vector.extract_strided_slice %63 {offsets = [0, 0], sizes = [8, 128], strides = [1, 1]} : vector<8x256xf32> to vector<8x128xf32>
    %65 = vector.extract_strided_slice %64 {offsets = [0, 0], sizes = [8, 96], strides = [1, 1]} : vector<8x128xf32> to vector<8x96xf32>
    %66 = arith.negf %65 : vector<8x96xf32>
    %67 = math.exp %66 : vector<8x96xf32>
    %cst_22 = arith.constant 1.000000e+00 : f32
    %68 = vector.broadcast %cst_22 : f32 to vector<8x96xf32>
    %69 = arith.addf %68, %67 : vector<8x96xf32>
    %70 = arith.divf %68, %69 : vector<8x96xf32>
    %71 = vector.extract_strided_slice %70 {offsets = [0, 0], sizes = [8, 32], strides = [1, 1]} : vector<8x96xf32> to vector<8x32xf32>
    %72 = vector.extract_strided_slice %70 {offsets = [0, 32], sizes = [8, 32], strides = [1, 1]} : vector<8x96xf32> to vector<8x32xf32>
    %73 = vector.extract_strided_slice %70 {offsets = [0, 64], sizes = [8, 32], strides = [1, 1]} : vector<8x96xf32> to vector<8x32xf32>
    %74 = vector.extract_strided_slice %64 {offsets = [0, 96], sizes = [8, 32], strides = [1, 1]} : vector<8x128xf32> to vector<8x32xf32>
    %75 = math.tanh %74 : vector<8x32xf32>
    %76 = arith.mulf %72, %33 : vector<8x32xf32>
    %77 = arith.mulf %71, %75 : vector<8x32xf32>
    %78 = arith.addf %76, %77 : vector<8x32xf32>
    %79 = math.tanh %78 : vector<8x32xf32>
    %80 = arith.mulf %73, %79 : vector<8x32xf32>
    %81 = vector.extract_strided_slice %63 {offsets = [0, 128], sizes = [8, 128], strides = [1, 1]} : vector<8x256xf32> to vector<8x128xf32>
    %82 = vector.extract_strided_slice %81 {offsets = [0, 0], sizes = [8, 96], strides = [1, 1]} : vector<8x128xf32> to vector<8x96xf32>
    %83 = arith.negf %82 : vector<8x96xf32>
    %84 = math.exp %83 : vector<8x96xf32>
    %cst_23 = arith.constant 1.000000e+00 : f32
    %85 = vector.broadcast %cst_23 : f32 to vector<8x96xf32>
    %86 = arith.addf %85, %84 : vector<8x96xf32>
    %87 = arith.divf %85, %86 : vector<8x96xf32>
    %88 = vector.extract_strided_slice %87 {offsets = [0, 0], sizes = [8, 32], strides = [1, 1]} : vector<8x96xf32> to vector<8x32xf32>
    %89 = vector.extract_strided_slice %87 {offsets = [0, 32], sizes = [8, 32], strides = [1, 1]} : vector<8x96xf32> to vector<8x32xf32>
    %90 = vector.extract_strided_slice %87 {offsets = [0, 64], sizes = [8, 32], strides = [1, 1]} : vector<8x96xf32> to vector<8x32xf32>
    %91 = vector.extract_strided_slice %81 {offsets = [0, 96], sizes = [8, 32], strides = [1, 1]} : vector<8x128xf32> to vector<8x32xf32>
    %92 = math.tanh %91 : vector<8x32xf32>
    %93 = arith.mulf %89, %50 : vector<8x32xf32>
    %94 = arith.mulf %88, %92 : vector<8x32xf32>
    %95 = arith.addf %93, %94 : vector<8x32xf32>
    %96 = math.tanh %95 : vector<8x32xf32>
    %97 = arith.mulf %90, %96 : vector<8x32xf32>
    %c8_24 = arith.constant 8 : index
    %c0_25 = arith.constant 0 : index
    %98 = vector.load %arg9[%c8_24, %c0_25] : memref<64x64xf32, #tpu.memory_space<vmem>>, vector<8x32xf32>
    tpu.vector_store %arg9[%c8_24, %c0_25], %80 {strides = array<i32>} : memref<64x64xf32, #tpu.memory_space<vmem>>, vector<8x32xf32>,
    %c48_26 = arith.constant 48 : index
    %c32_27 = arith.constant 32 : index
    %99 = vector.load %arg9[%c48_26, %c32_27] : memref<64x64xf32, #tpu.memory_space<vmem>>, vector<8x32xf32>
    tpu.vector_store %arg9[%c48_26, %c32_27], %97 {strides = array<i32>} : memref<64x64xf32, #tpu.memory_space<vmem>>, vector<8x32xf32>,
    %c16 = arith.constant 16 : index
    %c0_28 = arith.constant 0 : index
    %100 = vector.load %arg8[%c16, %c0_28] : memref<64x256xf32, #tpu.memory_space<vmem>>, vector<8x128xf32>
    %c40 = arith.constant 40 : index
    %c128_29 = arith.constant 128 : index
    %101 = vector.load %arg8[%c40, %c128_29] : memref<64x256xf32, #tpu.memory_space<vmem>>, vector<8x128xf32>
    %102 = tpu.concatenate %100, %101 in 1 : vector<8x128xf32>, vector<8x128xf32> -> vector<8x256xf32>
    %103 = tpu.concatenate %80, %97 in 1 : vector<8x32xf32>, vector<8x32xf32> -> vector<8x64xf32>
    %104 = arith.truncf %103 : vector<8x64xf32> to vector<8x64xbf16>
    %c0_30 = arith.constant 0 : index
    %c0_31 = arith.constant 0 : index
    %c0_32 = arith.constant 0 : index
    %105 = vector.load %arg3[%c0_30, %c0_31, %c0_32] : memref<1x64x256xbf16, #tpu.memory_space<vmem>>, vector<1x64x256xbf16>
    %106 = vector.shape_cast %105 : vector<1x64x256xbf16> to vector<64x256xbf16>
    %cst_33 = arith.constant dense<0.000000e+00> : vector<8x256xf32>
    %107 = tpu.matmul %104, %106, %cst_33 {dimension_numbers = #tpu.dot_dimension_numbers<[1], [0], [0], [1], [0, 0, 1, 1], [], []>} : vector<8x64xbf16>, vector<64x256xbf16>, vector<8x256xf32> -> vector<8x256xf32>
    %108 = arith.addf %102, %107 : vector<8x256xf32>
    %109 = vector.extract_strided_slice %108 {offsets = [0, 0], sizes = [8, 128], strides = [1, 1]} : vector<8x256xf32> to vector<8x128xf32>
    %110 = vector.extract_strided_slice %109 {offsets = [0, 0], sizes = [8, 96], strides = [1, 1]} : vector<8x128xf32> to vector<8x96xf32>
    %111 = arith.negf %110 : vector<8x96xf32>
    %112 = math.exp %111 : vector<8x96xf32>
    %cst_34 = arith.constant 1.000000e+00 : f32
    %113 = vector.broadcast %cst_34 : f32 to vector<8x96xf32>
    %114 = arith.addf %113, %112 : vector<8x96xf32>
    %115 = arith.divf %113, %114 : vector<8x96xf32>
    %116 = vector.extract_strided_slice %115 {offsets = [0, 0], sizes = [8, 32], strides = [1, 1]} : vector<8x96xf32> to vector<8x32xf32>
    %117 = vector.extract_strided_slice %115 {offsets = [0, 32], sizes = [8, 32], strides = [1, 1]} : vector<8x96xf32> to vector<8x32xf32>
    %118 = vector.extract_strided_slice %115 {offsets = [0, 64], sizes = [8, 32], strides = [1, 1]} : vector<8x96xf32> to vector<8x32xf32>
    %119 = vector.extract_strided_slice %109 {offsets = [0, 96], sizes = [8, 32], strides = [1, 1]} : vector<8x128xf32> to vector<8x32xf32>
    %120 = math.tanh %119 : vector<8x32xf32>
    %121 = arith.mulf %117, %78 : vector<8x32xf32>
    %122 = arith.mulf %116, %120 : vector<8x32xf32>
    %123 = arith.addf %121, %122 : vector<8x32xf32>
    %124 = math.tanh %123 : vector<8x32xf32>
    %125 = arith.mulf %118, %124 : vector<8x32xf32>
    %126 = vector.extract_strided_slice %108 {offsets = [0, 128], sizes = [8, 128], strides = [1, 1]} : vector<8x256xf32> to vector<8x128xf32>
    %127 = vector.extract_strided_slice %126 {offsets = [0, 0], sizes = [8, 96], strides = [1, 1]} : vector<8x128xf32> to vector<8x96xf32>
    %128 = arith.negf %127 : vector<8x96xf32>
    %129 = math.exp %128 : vector<8x96xf32>
    %cst_35 = arith.constant 1.000000e+00 : f32
    %130 = vector.broadcast %cst_35 : f32 to vector<8x96xf32>
    %131 = arith.addf %130, %129 : vector<8x96xf32>
    %132 = arith.divf %130, %131 : vector<8x96xf32>
    %133 = vector.extract_strided_slice %132 {offsets = [0, 0], sizes = [8, 32], strides = [1, 1]} : vector<8x96xf32> to vector<8x32xf32>
    %134 = vector.extract_strided_slice %132 {offsets = [0, 32], sizes = [8, 32], strides = [1, 1]} : vector<8x96xf32> to vector<8x32xf32>
    %135 = vector.extract_strided_slice %132 {offsets = [0, 64], sizes = [8, 32], strides = [1, 1]} : vector<8x96xf32> to vector<8x32xf32>
    %136 = vector.extract_strided_slice %126 {offsets = [0, 96], sizes = [8, 32], strides = [1, 1]} : vector<8x128xf32> to vector<8x32xf32>
    %137 = math.tanh %136 : vector<8x32xf32>
    %138 = arith.mulf %134, %95 : vector<8x32xf32>
    %139 = arith.mulf %133, %137 : vector<8x32xf32>
    %140 = arith.addf %138, %139 : vector<8x32xf32>
    %141 = math.tanh %140 : vector<8x32xf32>
    %142 = arith.mulf %135, %141 : vector<8x32xf32>
    %c16_36 = arith.constant 16 : index
    %c0_37 = arith.constant 0 : index
    %143 = vector.load %arg9[%c16_36, %c0_37] : memref<64x64xf32, #tpu.memory_space<vmem>>, vector<8x32xf32>
    tpu.vector_store %arg9[%c16_36, %c0_37], %125 {strides = array<i32>} : memref<64x64xf32, #tpu.memory_space<vmem>>, vector<8x32xf32>,
    %c40_38 = arith.constant 40 : index
    %c32_39 = arith.constant 32 : index
    %144 = vector.load %arg9[%c40_38, %c32_39] : memref<64x64xf32, #tpu.memory_space<vmem>>, vector<8x32xf32>
    tpu.vector_store %arg9[%c40_38, %c32_39], %142 {strides = array<i32>} : memref<64x64xf32, #tpu.memory_space<vmem>>, vector<8x32xf32>,
    %c24 = arith.constant 24 : index
    %c0_40 = arith.constant 0 : index
    %145 = vector.load %arg8[%c24, %c0_40] : memref<64x256xf32, #tpu.memory_space<vmem>>, vector<8x128xf32>
    %c32_41 = arith.constant 32 : index
    %c128_42 = arith.constant 128 : index
    %146 = vector.load %arg8[%c32_41, %c128_42] : memref<64x256xf32, #tpu.memory_space<vmem>>, vector<8x128xf32>
    %147 = tpu.concatenate %145, %146 in 1 : vector<8x128xf32>, vector<8x128xf32> -> vector<8x256xf32>
    %148 = tpu.concatenate %125, %142 in 1 : vector<8x32xf32>, vector<8x32xf32> -> vector<8x64xf32>
    %149 = arith.truncf %148 : vector<8x64xf32> to vector<8x64xbf16>
    %c0_43 = arith.constant 0 : index
    %c0_44 = arith.constant 0 : index
    %c0_45 = arith.constant 0 : index
    %150 = vector.load %arg3[%c0_43, %c0_44, %c0_45] : memref<1x64x256xbf16, #tpu.memory_space<vmem>>, vector<1x64x256xbf16>
    %151 = vector.shape_cast %150 : vector<1x64x256xbf16> to vector<64x256xbf16>
    %cst_46 = arith.constant dense<0.000000e+00> : vector<8x256xf32>
    %152 = tpu.matmul %149, %151, %cst_46 {dimension_numbers = #tpu.dot_dimension_numbers<[1], [0], [0], [1], [0, 0, 1, 1], [], []>} : vector<8x64xbf16>, vector<64x256xbf16>, vector<8x256xf32> -> vector<8x256xf32>
    %153 = arith.addf %147, %152 : vector<8x256xf32>
    %154 = vector.extract_strided_slice %153 {offsets = [0, 0], sizes = [8, 128], strides = [1, 1]} : vector<8x256xf32> to vector<8x128xf32>
    %155 = vector.extract_strided_slice %154 {offsets = [0, 0], sizes = [8, 96], strides = [1, 1]} : vector<8x128xf32> to vector<8x96xf32>
    %156 = arith.negf %155 : vector<8x96xf32>
    %157 = math.exp %156 : vector<8x96xf32>
    %cst_47 = arith.constant 1.000000e+00 : f32
    %158 = vector.broadcast %cst_47 : f32 to vector<8x96xf32>
    %159 = arith.addf %158, %157 : vector<8x96xf32>
    %160 = arith.divf %158, %159 : vector<8x96xf32>
    %161 = vector.extract_strided_slice %160 {offsets = [0, 0], sizes = [8, 32], strides = [1, 1]} : vector<8x96xf32> to vector<8x32xf32>
    %162 = vector.extract_strided_slice %160 {offsets = [0, 32], sizes = [8, 32], strides = [1, 1]} : vector<8x96xf32> to vector<8x32xf32>
    %163 = vector.extract_strided_slice %160 {offsets = [0, 64], sizes = [8, 32], strides = [1, 1]} : vector<8x96xf32> to vector<8x32xf32>
    %164 = vector.extract_strided_slice %154 {offsets = [0, 96], sizes = [8, 32], strides = [1, 1]} : vector<8x128xf32> to vector<8x32xf32>
    %165 = math.tanh %164 : vector<8x32xf32>
    %166 = arith.mulf %162, %123 : vector<8x32xf32>
    %167 = arith.mulf %161, %165 : vector<8x32xf32>
    %168 = arith.addf %166, %167 : vector<8x32xf32>
    %169 = math.tanh %168 : vector<8x32xf32>
    %170 = arith.mulf %163, %169 : vector<8x32xf32>
    %171 = vector.extract_strided_slice %153 {offsets = [0, 128], sizes = [8, 128], strides = [1, 1]} : vector<8x256xf32> to vector<8x128xf32>
    %172 = vector.extract_strided_slice %171 {offsets = [0, 0], sizes = [8, 96], strides = [1, 1]} : vector<8x128xf32> to vector<8x96xf32>
    %173 = arith.negf %172 : vector<8x96xf32>
    %174 = math.exp %173 : vector<8x96xf32>
    %cst_48 = arith.constant 1.000000e+00 : f32
    %175 = vector.broadcast %cst_48 : f32 to vector<8x96xf32>
    %176 = arith.addf %175, %174 : vector<8x96xf32>
    %177 = arith.divf %175, %176 : vector<8x96xf32>
    %178 = vector.extract_strided_slice %177 {offsets = [0, 0], sizes = [8, 32], strides = [1, 1]} : vector<8x96xf32> to vector<8x32xf32>
    %179 = vector.extract_strided_slice %177 {offsets = [0, 32], sizes = [8, 32], strides = [1, 1]} : vector<8x96xf32> to vector<8x32xf32>
    %180 = vector.extract_strided_slice %177 {offsets = [0, 64], sizes = [8, 32], strides = [1, 1]} : vector<8x96xf32> to vector<8x32xf32>
    %181 = vector.extract_strided_slice %171 {offsets = [0, 96], sizes = [8, 32], strides = [1, 1]} : vector<8x128xf32> to vector<8x32xf32>
    %182 = math.tanh %181 : vector<8x32xf32>
    %183 = arith.mulf %179, %140 : vector<8x32xf32>
    %184 = arith.mulf %178, %182 : vector<8x32xf32>
    %185 = arith.addf %183, %184 : vector<8x32xf32>
    %186 = math.tanh %185 : vector<8x32xf32>
    %187 = arith.mulf %180, %186 : vector<8x32xf32>
    %c24_49 = arith.constant 24 : index
    %c0_50 = arith.constant 0 : index
    %188 = vector.load %arg9[%c24_49, %c0_50] : memref<64x64xf32, #tpu.memory_space<vmem>>, vector<8x32xf32>
    tpu.vector_store %arg9[%c24_49, %c0_50], %170 {strides = array<i32>} : memref<64x64xf32, #tpu.memory_space<vmem>>, vector<8x32xf32>,
    %c32_51 = arith.constant 32 : index
    %c32_52 = arith.constant 32 : index
    %189 = vector.load %arg9[%c32_51, %c32_52] : memref<64x64xf32, #tpu.memory_space<vmem>>, vector<8x32xf32>
    tpu.vector_store %arg9[%c32_51, %c32_52], %187 {strides = array<i32>} : memref<64x64xf32, #tpu.memory_space<vmem>>, vector<8x32xf32>,
    %c32_53 = arith.constant 32 : index
    %c0_54 = arith.constant 0 : index
    %190 = vector.load %arg8[%c32_53, %c0_54] : memref<64x256xf32, #tpu.memory_space<vmem>>, vector<8x128xf32>
    %c24_55 = arith.constant 24 : index
    %c128_56 = arith.constant 128 : index
    %191 = vector.load %arg8[%c24_55, %c128_56] : memref<64x256xf32, #tpu.memory_space<vmem>>, vector<8x128xf32>
    %192 = tpu.concatenate %190, %191 in 1 : vector<8x128xf32>, vector<8x128xf32> -> vector<8x256xf32>
    %193 = tpu.concatenate %170, %187 in 1 : vector<8x32xf32>, vector<8x32xf32> -> vector<8x64xf32>
    %194 = arith.truncf %193 : vector<8x64xf32> to vector<8x64xbf16>
    %c0_57 = arith.constant 0 : index
    %c0_58 = arith.constant 0 : index
    %c0_59 = arith.constant 0 : index
    %195 = vector.load %arg3[%c0_57, %c0_58, %c0_59] : memref<1x64x256xbf16, #tpu.memory_space<vmem>>, vector<1x64x256xbf16>
    %196 = vector.shape_cast %195 : vector<1x64x256xbf16> to vector<64x256xbf16>
    %cst_60 = arith.constant dense<0.000000e+00> : vector<8x256xf32>
    %197 = tpu.matmul %194, %196, %cst_60 {dimension_numbers = #tpu.dot_dimension_numbers<[1], [0], [0], [1], [0, 0, 1, 1], [], []>} : vector<8x64xbf16>, vector<64x256xbf16>, vector<8x256xf32> -> vector<8x256xf32>
    %198 = arith.addf %192, %197 : vector<8x256xf32>
    %199 = vector.extract_strided_slice %198 {offsets = [0, 0], sizes = [8, 128], strides = [1, 1]} : vector<8x256xf32> to vector<8x128xf32>
    %200 = vector.extract_strided_slice %199 {offsets = [0, 0], sizes = [8, 96], strides = [1, 1]} : vector<8x128xf32> to vector<8x96xf32>
    %201 = arith.negf %200 : vector<8x96xf32>
    %202 = math.exp %201 : vector<8x96xf32>
    %cst_61 = arith.constant 1.000000e+00 : f32
    %203 = vector.broadcast %cst_61 : f32 to vector<8x96xf32>
    %204 = arith.addf %203, %202 : vector<8x96xf32>
    %205 = arith.divf %203, %204 : vector<8x96xf32>
    %206 = vector.extract_strided_slice %205 {offsets = [0, 0], sizes = [8, 32], strides = [1, 1]} : vector<8x96xf32> to vector<8x32xf32>
    %207 = vector.extract_strided_slice %205 {offsets = [0, 32], sizes = [8, 32], strides = [1, 1]} : vector<8x96xf32> to vector<8x32xf32>
    %208 = vector.extract_strided_slice %205 {offsets = [0, 64], sizes = [8, 32], strides = [1, 1]} : vector<8x96xf32> to vector<8x32xf32>
    %209 = vector.extract_strided_slice %199 {offsets = [0, 96], sizes = [8, 32], strides = [1, 1]} : vector<8x128xf32> to vector<8x32xf32>
    %210 = math.tanh %209 : vector<8x32xf32>
    %211 = arith.mulf %207, %168 : vector<8x32xf32>
    %212 = arith.mulf %206, %210 : vector<8x32xf32>
    %213 = arith.addf %211, %212 : vector<8x32xf32>
    %214 = math.tanh %213 : vector<8x32xf32>
    %215 = arith.mulf %208, %214 : vector<8x32xf32>
    %216 = vector.extract_strided_slice %198 {offsets = [0, 128], sizes = [8, 128], strides = [1, 1]} : vector<8x256xf32> to vector<8x128xf32>
    %217 = vector.extract_strided_slice %216 {offsets = [0, 0], sizes = [8, 96], strides = [1, 1]} : vector<8x128xf32> to vector<8x96xf32>
    %218 = arith.negf %217 : vector<8x96xf32>
    %219 = math.exp %218 : vector<8x96xf32>
    %cst_62 = arith.constant 1.000000e+00 : f32
    %220 = vector.broadcast %cst_62 : f32 to vector<8x96xf32>
    %221 = arith.addf %220, %219 : vector<8x96xf32>
    %222 = arith.divf %220, %221 : vector<8x96xf32>
    %223 = vector.extract_strided_slice %222 {offsets = [0, 0], sizes = [8, 32], strides = [1, 1]} : vector<8x96xf32> to vector<8x32xf32>
    %224 = vector.extract_strided_slice %222 {offsets = [0, 32], sizes = [8, 32], strides = [1, 1]} : vector<8x96xf32> to vector<8x32xf32>
    %225 = vector.extract_strided_slice %222 {offsets = [0, 64], sizes = [8, 32], strides = [1, 1]} : vector<8x96xf32> to vector<8x32xf32>
    %226 = vector.extract_strided_slice %216 {offsets = [0, 96], sizes = [8, 32], strides = [1, 1]} : vector<8x128xf32> to vector<8x32xf32>
    %227 = math.tanh %226 : vector<8x32xf32>
    %228 = arith.mulf %224, %185 : vector<8x32xf32>
    %229 = arith.mulf %223, %227 : vector<8x32xf32>
    %230 = arith.addf %228, %229 : vector<8x32xf32>
    %231 = math.tanh %230 : vector<8x32xf32>
    %232 = arith.mulf %225, %231 : vector<8x32xf32>
    %c32_63 = arith.constant 32 : index
    %c0_64 = arith.constant 0 : index
    %233 = vector.load %arg9[%c32_63, %c0_64] : memref<64x64xf32, #tpu.memory_space<vmem>>, vector<8x32xf32>
    tpu.vector_store %arg9[%c32_63, %c0_64], %215 {strides = array<i32>} : memref<64x64xf32, #tpu.memory_space<vmem>>, vector<8x32xf32>,
    %c24_65 = arith.constant 24 : index
    %c32_66 = arith.constant 32 : index
    %234 = vector.load %arg9[%c24_65, %c32_66] : memref<64x64xf32, #tpu.memory_space<vmem>>, vector<8x32xf32>
    tpu.vector_store %arg9[%c24_65, %c32_66], %232 {strides = array<i32>} : memref<64x64xf32, #tpu.memory_space<vmem>>, vector<8x32xf32>,
    %c40_67 = arith.constant 40 : index
    %c0_68 = arith.constant 0 : index
    %235 = vector.load %arg8[%c40_67, %c0_68] : memref<64x256xf32, #tpu.memory_space<vmem>>, vector<8x128xf32>
    %c16_69 = arith.constant 16 : index
    %c128_70 = arith.constant 128 : index
    %236 = vector.load %arg8[%c16_69, %c128_70] : memref<64x256xf32, #tpu.memory_space<vmem>>, vector<8x128xf32>
    %237 = tpu.concatenate %235, %236 in 1 : vector<8x128xf32>, vector<8x128xf32> -> vector<8x256xf32>
    %238 = tpu.concatenate %215, %232 in 1 : vector<8x32xf32>, vector<8x32xf32> -> vector<8x64xf32>
    %239 = arith.truncf %238 : vector<8x64xf32> to vector<8x64xbf16>
    %c0_71 = arith.constant 0 : index
    %c0_72 = arith.constant 0 : index
    %c0_73 = arith.constant 0 : index
    %240 = vector.load %arg3[%c0_71, %c0_72, %c0_73] : memref<1x64x256xbf16, #tpu.memory_space<vmem>>, vector<1x64x256xbf16>
    %241 = vector.shape_cast %240 : vector<1x64x256xbf16> to vector<64x256xbf16>
    %cst_74 = arith.constant dense<0.000000e+00> : vector<8x256xf32>
    %242 = tpu.matmul %239, %241, %cst_74 {dimension_numbers = #tpu.dot_dimension_numbers<[1], [0], [0], [1], [0, 0, 1, 1], [], []>} : vector<8x64xbf16>, vector<64x256xbf16>, vector<8x256xf32> -> vector<8x256xf32>
    %243 = arith.addf %237, %242 : vector<8x256xf32>
    %244 = vector.extract_strided_slice %243 {offsets = [0, 0], sizes = [8, 128], strides = [1, 1]} : vector<8x256xf32> to vector<8x128xf32>
    %245 = vector.extract_strided_slice %244 {offsets = [0, 0], sizes = [8, 96], strides = [1, 1]} : vector<8x128xf32> to vector<8x96xf32>
    %246 = arith.negf %245 : vector<8x96xf32>
    %247 = math.exp %246 : vector<8x96xf32>
    %cst_75 = arith.constant 1.000000e+00 : f32
    %248 = vector.broadcast %cst_75 : f32 to vector<8x96xf32>
    %249 = arith.addf %248, %247 : vector<8x96xf32>
    %250 = arith.divf %248, %249 : vector<8x96xf32>
    %251 = vector.extract_strided_slice %250 {offsets = [0, 0], sizes = [8, 32], strides = [1, 1]} : vector<8x96xf32> to vector<8x32xf32>
    %252 = vector.extract_strided_slice %250 {offsets = [0, 32], sizes = [8, 32], strides = [1, 1]} : vector<8x96xf32> to vector<8x32xf32>
    %253 = vector.extract_strided_slice %250 {offsets = [0, 64], sizes = [8, 32], strides = [1, 1]} : vector<8x96xf32> to vector<8x32xf32>
    %254 = vector.extract_strided_slice %244 {offsets = [0, 96], sizes = [8, 32], strides = [1, 1]} : vector<8x128xf32> to vector<8x32xf32>
    %255 = math.tanh %254 : vector<8x32xf32>
    %256 = arith.mulf %252, %213 : vector<8x32xf32>
    %257 = arith.mulf %251, %255 : vector<8x32xf32>
    %258 = arith.addf %256, %257 : vector<8x32xf32>
    %259 = math.tanh %258 : vector<8x32xf32>
    %260 = arith.mulf %253, %259 : vector<8x32xf32>
    %261 = vector.extract_strided_slice %243 {offsets = [0, 128], sizes = [8, 128], strides = [1, 1]} : vector<8x256xf32> to vector<8x128xf32>
    %262 = vector.extract_strided_slice %261 {offsets = [0, 0], sizes = [8, 96], strides = [1, 1]} : vector<8x128xf32> to vector<8x96xf32>
    %263 = arith.negf %262 : vector<8x96xf32>
    %264 = math.exp %263 : vector<8x96xf32>
    %cst_76 = arith.constant 1.000000e+00 : f32
    %265 = vector.broadcast %cst_76 : f32 to vector<8x96xf32>
    %266 = arith.addf %265, %264 : vector<8x96xf32>
    %267 = arith.divf %265, %266 : vector<8x96xf32>
    %268 = vector.extract_strided_slice %267 {offsets = [0, 0], sizes = [8, 32], strides = [1, 1]} : vector<8x96xf32> to vector<8x32xf32>
    %269 = vector.extract_strided_slice %267 {offsets = [0, 32], sizes = [8, 32], strides = [1, 1]} : vector<8x96xf32> to vector<8x32xf32>
    %270 = vector.extract_strided_slice %267 {offsets = [0, 64], sizes = [8, 32], strides = [1, 1]} : vector<8x96xf32> to vector<8x32xf32>
    %271 = vector.extract_strided_slice %261 {offsets = [0, 96], sizes = [8, 32], strides = [1, 1]} : vector<8x128xf32> to vector<8x32xf32>
    %272 = math.tanh %271 : vector<8x32xf32>
    %273 = arith.mulf %269, %230 : vector<8x32xf32>
    %274 = arith.mulf %268, %272 : vector<8x32xf32>
    %275 = arith.addf %273, %274 : vector<8x32xf32>
    %276 = math.tanh %275 : vector<8x32xf32>
    %277 = arith.mulf %270, %276 : vector<8x32xf32>
    %c40_77 = arith.constant 40 : index
    %c0_78 = arith.constant 0 : index
    %278 = vector.load %arg9[%c40_77, %c0_78] : memref<64x64xf32, #tpu.memory_space<vmem>>, vector<8x32xf32>
    tpu.vector_store %arg9[%c40_77, %c0_78], %260 {strides = array<i32>} : memref<64x64xf32, #tpu.memory_space<vmem>>, vector<8x32xf32>,
    %c16_79 = arith.constant 16 : index
    %c32_80 = arith.constant 32 : index
    %279 = vector.load %arg9[%c16_79, %c32_80] : memref<64x64xf32, #tpu.memory_space<vmem>>, vector<8x32xf32>
    tpu.vector_store %arg9[%c16_79, %c32_80], %277 {strides = array<i32>} : memref<64x64xf32, #tpu.memory_space<vmem>>, vector<8x32xf32>,
    %c48_81 = arith.constant 48 : index
    %c0_82 = arith.constant 0 : index
    %280 = vector.load %arg8[%c48_81, %c0_82] : memref<64x256xf32, #tpu.memory_space<vmem>>, vector<8x128xf32>
    %c8_83 = arith.constant 8 : index
    %c128_84 = arith.constant 128 : index
    %281 = vector.load %arg8[%c8_83, %c128_84] : memref<64x256xf32, #tpu.memory_space<vmem>>, vector<8x128xf32>
    %282 = tpu.concatenate %280, %281 in 1 : vector<8x128xf32>, vector<8x128xf32> -> vector<8x256xf32>
    %283 = tpu.concatenate %260, %277 in 1 : vector<8x32xf32>, vector<8x32xf32> -> vector<8x64xf32>
    %284 = arith.truncf %283 : vector<8x64xf32> to vector<8x64xbf16>
    %c0_85 = arith.constant 0 : index
    %c0_86 = arith.constant 0 : index
    %c0_87 = arith.constant 0 : index
    %285 = vector.load %arg3[%c0_85, %c0_86, %c0_87] : memref<1x64x256xbf16, #tpu.memory_space<vmem>>, vector<1x64x256xbf16>
    %286 = vector.shape_cast %285 : vector<1x64x256xbf16> to vector<64x256xbf16>
    %cst_88 = arith.constant dense<0.000000e+00> : vector<8x256xf32>
    %287 = tpu.matmul %284, %286, %cst_88 {dimension_numbers = #tpu.dot_dimension_numbers<[1], [0], [0], [1], [0, 0, 1, 1], [], []>} : vector<8x64xbf16>, vector<64x256xbf16>, vector<8x256xf32> -> vector<8x256xf32>
    %288 = arith.addf %282, %287 : vector<8x256xf32>
    %289 = vector.extract_strided_slice %288 {offsets = [0, 0], sizes = [8, 128], strides = [1, 1]} : vector<8x256xf32> to vector<8x128xf32>
    %290 = vector.extract_strided_slice %289 {offsets = [0, 0], sizes = [8, 96], strides = [1, 1]} : vector<8x128xf32> to vector<8x96xf32>
    %291 = arith.negf %290 : vector<8x96xf32>
    %292 = math.exp %291 : vector<8x96xf32>
    %cst_89 = arith.constant 1.000000e+00 : f32
    %293 = vector.broadcast %cst_89 : f32 to vector<8x96xf32>
    %294 = arith.addf %293, %292 : vector<8x96xf32>
    %295 = arith.divf %293, %294 : vector<8x96xf32>
    %296 = vector.extract_strided_slice %295 {offsets = [0, 0], sizes = [8, 32], strides = [1, 1]} : vector<8x96xf32> to vector<8x32xf32>
    %297 = vector.extract_strided_slice %295 {offsets = [0, 32], sizes = [8, 32], strides = [1, 1]} : vector<8x96xf32> to vector<8x32xf32>
    %298 = vector.extract_strided_slice %295 {offsets = [0, 64], sizes = [8, 32], strides = [1, 1]} : vector<8x96xf32> to vector<8x32xf32>
    %299 = vector.extract_strided_slice %289 {offsets = [0, 96], sizes = [8, 32], strides = [1, 1]} : vector<8x128xf32> to vector<8x32xf32>
    %300 = math.tanh %299 : vector<8x32xf32>
    %301 = arith.mulf %297, %258 : vector<8x32xf32>
    %302 = arith.mulf %296, %300 : vector<8x32xf32>
    %303 = arith.addf %301, %302 : vector<8x32xf32>
    %304 = math.tanh %303 : vector<8x32xf32>
    %305 = arith.mulf %298, %304 : vector<8x32xf32>
    %306 = vector.extract_strided_slice %288 {offsets = [0, 128], sizes = [8, 128], strides = [1, 1]} : vector<8x256xf32> to vector<8x128xf32>
    %307 = vector.extract_strided_slice %306 {offsets = [0, 0], sizes = [8, 96], strides = [1, 1]} : vector<8x128xf32> to vector<8x96xf32>
    %308 = arith.negf %307 : vector<8x96xf32>
    %309 = math.exp %308 : vector<8x96xf32>
    %cst_90 = arith.constant 1.000000e+00 : f32
    %310 = vector.broadcast %cst_90 : f32 to vector<8x96xf32>
    %311 = arith.addf %310, %309 : vector<8x96xf32>
    %312 = arith.divf %310, %311 : vector<8x96xf32>
    %313 = vector.extract_strided_slice %312 {offsets = [0, 0], sizes = [8, 32], strides = [1, 1]} : vector<8x96xf32> to vector<8x32xf32>
    %314 = vector.extract_strided_slice %312 {offsets = [0, 32], sizes = [8, 32], strides = [1, 1]} : vector<8x96xf32> to vector<8x32xf32>
    %315 = vector.extract_strided_slice %312 {offsets = [0, 64], sizes = [8, 32], strides = [1, 1]} : vector<8x96xf32> to vector<8x32xf32>
    %316 = vector.extract_strided_slice %306 {offsets = [0, 96], sizes = [8, 32], strides = [1, 1]} : vector<8x128xf32> to vector<8x32xf32>
    %317 = math.tanh %316 : vector<8x32xf32>
    %318 = arith.mulf %314, %275 : vector<8x32xf32>
    %319 = arith.mulf %313, %317 : vector<8x32xf32>
    %320 = arith.addf %318, %319 : vector<8x32xf32>
    %321 = math.tanh %320 : vector<8x32xf32>
    %322 = arith.mulf %315, %321 : vector<8x32xf32>
    %c48_91 = arith.constant 48 : index
    %c0_92 = arith.constant 0 : index
    %323 = vector.load %arg9[%c48_91, %c0_92] : memref<64x64xf32, #tpu.memory_space<vmem>>, vector<8x32xf32>
    tpu.vector_store %arg9[%c48_91, %c0_92], %305 {strides = array<i32>} : memref<64x64xf32, #tpu.memory_space<vmem>>, vector<8x32xf32>,
    %c8_93 = arith.constant 8 : index
    %c32_94 = arith.constant 32 : index
    %324 = vector.load %arg9[%c8_93, %c32_94] : memref<64x64xf32, #tpu.memory_space<vmem>>, vector<8x32xf32>
    tpu.vector_store %arg9[%c8_93, %c32_94], %322 {strides = array<i32>} : memref<64x64xf32, #tpu.memory_space<vmem>>, vector<8x32xf32>,
    %c56_95 = arith.constant 56 : index
    %c0_96 = arith.constant 0 : index
    %325 = vector.load %arg8[%c56_95, %c0_96] : memref<64x256xf32, #tpu.memory_space<vmem>>, vector<8x128xf32>
    %c0_97 = arith.constant 0 : index
    %c128_98 = arith.constant 128 : index
    %326 = vector.load %arg8[%c0_97, %c128_98] : memref<64x256xf32, #tpu.memory_space<vmem>>, vector<8x128xf32>
    %327 = tpu.concatenate %325, %326 in 1 : vector<8x128xf32>, vector<8x128xf32> -> vector<8x256xf32>
    %328 = tpu.concatenate %305, %322 in 1 : vector<8x32xf32>, vector<8x32xf32> -> vector<8x64xf32>
    %329 = arith.truncf %328 : vector<8x64xf32> to vector<8x64xbf16>
    %c0_99 = arith.constant 0 : index
    %c0_100 = arith.constant 0 : index
    %c0_101 = arith.constant 0 : index
    %330 = vector.load %arg3[%c0_99, %c0_100, %c0_101] : memref<1x64x256xbf16, #tpu.memory_space<vmem>>, vector<1x64x256xbf16>
    %331 = vector.shape_cast %330 : vector<1x64x256xbf16> to vector<64x256xbf16>
    %cst_102 = arith.constant dense<0.000000e+00> : vector<8x256xf32>
    %332 = tpu.matmul %329, %331, %cst_102 {dimension_numbers = #tpu.dot_dimension_numbers<[1], [0], [0], [1], [0, 0, 1, 1], [], []>} : vector<8x64xbf16>, vector<64x256xbf16>, vector<8x256xf32> -> vector<8x256xf32>
    %333 = arith.addf %327, %332 : vector<8x256xf32>
    %334 = vector.extract_strided_slice %333 {offsets = [0, 0], sizes = [8, 128], strides = [1, 1]} : vector<8x256xf32> to vector<8x128xf32>
    %335 = vector.extract_strided_slice %334 {offsets = [0, 0], sizes = [8, 96], strides = [1, 1]} : vector<8x128xf32> to vector<8x96xf32>
    %336 = arith.negf %335 : vector<8x96xf32>
    %337 = math.exp %336 : vector<8x96xf32>
    %cst_103 = arith.constant 1.000000e+00 : f32
    %338 = vector.broadcast %cst_103 : f32 to vector<8x96xf32>
    %339 = arith.addf %338, %337 : vector<8x96xf32>
    %340 = arith.divf %338, %339 : vector<8x96xf32>
    %341 = vector.extract_strided_slice %340 {offsets = [0, 0], sizes = [8, 32], strides = [1, 1]} : vector<8x96xf32> to vector<8x32xf32>
    %342 = vector.extract_strided_slice %340 {offsets = [0, 32], sizes = [8, 32], strides = [1, 1]} : vector<8x96xf32> to vector<8x32xf32>
    %343 = vector.extract_strided_slice %340 {offsets = [0, 64], sizes = [8, 32], strides = [1, 1]} : vector<8x96xf32> to vector<8x32xf32>
    %344 = vector.extract_strided_slice %334 {offsets = [0, 96], sizes = [8, 32], strides = [1, 1]} : vector<8x128xf32> to vector<8x32xf32>
    %345 = math.tanh %344 : vector<8x32xf32>
    %346 = arith.mulf %342, %303 : vector<8x32xf32>
    %347 = arith.mulf %341, %345 : vector<8x32xf32>
    %348 = arith.addf %346, %347 : vector<8x32xf32>
    %349 = math.tanh %348 : vector<8x32xf32>
    %350 = arith.mulf %343, %349 : vector<8x32xf32>
    %351 = vector.extract_strided_slice %333 {offsets = [0, 128], sizes = [8, 128], strides = [1, 1]} : vector<8x256xf32> to vector<8x128xf32>
    %352 = vector.extract_strided_slice %351 {offsets = [0, 0], sizes = [8, 96], strides = [1, 1]} : vector<8x128xf32> to vector<8x96xf32>
    %353 = arith.negf %352 : vector<8x96xf32>
    %354 = math.exp %353 : vector<8x96xf32>
    %cst_104 = arith.constant 1.000000e+00 : f32
    %355 = vector.broadcast %cst_104 : f32 to vector<8x96xf32>
    %356 = arith.addf %355, %354 : vector<8x96xf32>
    %357 = arith.divf %355, %356 : vector<8x96xf32>
    %358 = vector.extract_strided_slice %357 {offsets = [0, 0], sizes = [8, 32], strides = [1, 1]} : vector<8x96xf32> to vector<8x32xf32>
    %359 = vector.extract_strided_slice %357 {offsets = [0, 32], sizes = [8, 32], strides = [1, 1]} : vector<8x96xf32> to vector<8x32xf32>
    %360 = vector.extract_strided_slice %357 {offsets = [0, 64], sizes = [8, 32], strides = [1, 1]} : vector<8x96xf32> to vector<8x32xf32>
    %361 = vector.extract_strided_slice %351 {offsets = [0, 96], sizes = [8, 32], strides = [1, 1]} : vector<8x128xf32> to vector<8x32xf32>
    %362 = math.tanh %361 : vector<8x32xf32>
    %363 = arith.mulf %359, %320 : vector<8x32xf32>
    %364 = arith.mulf %358, %362 : vector<8x32xf32>
    %365 = arith.addf %363, %364 : vector<8x32xf32>
    %366 = math.tanh %365 : vector<8x32xf32>
    %367 = arith.mulf %360, %366 : vector<8x32xf32>
    %c56_105 = arith.constant 56 : index
    %c0_106 = arith.constant 0 : index
    %368 = vector.load %arg9[%c56_105, %c0_106] : memref<64x64xf32, #tpu.memory_space<vmem>>, vector<8x32xf32>
    tpu.vector_store %arg9[%c56_105, %c0_106], %350 {strides = array<i32>} : memref<64x64xf32, #tpu.memory_space<vmem>>, vector<8x32xf32>,
    %c0_107 = arith.constant 0 : index
    %c32_108 = arith.constant 32 : index
    %369 = vector.load %arg9[%c0_107, %c32_108] : memref<64x64xf32, #tpu.memory_space<vmem>>, vector<8x32xf32>
    tpu.vector_store %arg9[%c0_107, %c32_108], %367 {strides = array<i32>} : memref<64x64xf32, #tpu.memory_space<vmem>>, vector<8x32xf32>,
    %c1_i32 = arith.constant 1 : i32
    %370 = arith.cmpi eq, %arg0, %c1_i32 : i32
    %371 = arith.extui %370 : i1 to i32
    %c0_i32_109 = arith.constant 0 : i32
    %372 = arith.cmpi ne, %371, %c0_i32_109 : i32
    scf.if %372 {
      %c0_110 = arith.constant 0 : index
      %c0_111 = arith.constant 0 : index
      %373 = vector.load %arg9[%c0_110, %c0_111] : memref<64x64xf32, #tpu.memory_space<vmem>>, vector<8x64xf32>
      %c56_112 = arith.constant 56 : index
      %c0_113 = arith.constant 0 : index
      %374 = vector.load %arg9[%c56_112, %c0_113] : memref<64x64xf32, #tpu.memory_space<vmem>>, vector<8x64xf32>
      %375 = tpu.concatenate %373, %374 in 1 : vector<8x64xf32>, vector<8x64xf32> -> vector<8x128xf32>
      %376 = arith.truncf %375 : vector<8x128xf32> to vector<8x128xbf16>
      %c0_114 = arith.constant 0 : index
      %c0_115 = arith.constant 0 : index
      %377 = vector.load %arg5[%c0_114, %c0_115] : memref<128x128xbf16, #tpu.memory_space<vmem>>, vector<128x128xbf16>
      %cst_116 = arith.constant dense<0.000000e+00> : vector<8x128xf32>
      %378 = tpu.matmul %376, %377, %cst_116 {dimension_numbers = #tpu.dot_dimension_numbers<[1], [0], [0], [1], [0, 0, 1, 1], [], []>} : vector<8x128xbf16>, vector<128x128xbf16>, vector<8x128xf32> -> vector<8x128xf32>
      %c0_117 = arith.constant 0 : index
      %c0_118 = arith.constant 0 : index
      %379 = vector.load %arg6[%c0_117, %c0_118] : memref<1x128xf32, #tpu.memory_space<vmem>>, vector<1x128xf32>
      %380 = vector.broadcast %379 : vector<1x128xf32> to vector<8x128xf32>
      %381 = arith.addf %378, %380 : vector<8x128xf32>
      %cst_119 = arith.constant dense<0xFF800000> : vector<8xf32>
      %382 = vector.multi_reduction <maximumf>, %381, %cst_119 [1] : vector<8x128xf32> to vector<8xf32>
      %383 = vector.shape_cast %382 : vector<8xf32> to vector<8x1xf32>
      %384 = vector.broadcast %383 : vector<8x1xf32> to vector<8x128xf32>
      %385 = arith.subf %381, %384 : vector<8x128xf32>
      %386 = math.exp %385 : vector<8x128xf32>
      %cst_120 = arith.constant dense<0.000000e+00> : vector<8xf32>
      %387 = vector.multi_reduction <add>, %386, %cst_120 [1] : vector<8x128xf32> to vector<8xf32>
      %388 = vector.shape_cast %387 : vector<8xf32> to vector<8x1xf32>
      %389 = tpu.reciprocal %388 {approx = true} : vector<8x1xf32> -> vector<8x1xf32>
      %390 = vector.broadcast %389 : vector<8x1xf32> to vector<8x128xf32>
      %391 = arith.mulf %386, %390 : vector<8x128xf32>
      %c0_121 = arith.constant 0 : index
      %c0_122 = arith.constant 0 : index
      %392 = vector.load %arg7[%c0_121, %c0_122] : memref<8x128xf32, #tpu.memory_space<vmem>>, vector<8x128xf32>
      tpu.vector_store %arg7[%c0_121, %c0_122], %391 {strides = array<i32>} : memref<8x128xf32, #tpu.memory_space<vmem>>, vector<8x128xf32>,
    } else {
    }
    return
  }
  func.func @transform_0(%arg0: i32) -> (i32, i32) {
    %c0_i32 = arith.constant 0 : i32
    %c0_i32_0 = arith.constant 0 : i32
    %c0_i32_1 = arith.constant 0 : i32
    return %c0_i32, %c0_i32_0 : i32, i32
  }
  func.func @transform_1(%arg0: i32) -> (i32, i32, i32) {
    %c0_i32 = arith.constant 0 : i32
    %c0_i32_0 = arith.constant 0 : i32
    %c0_i32_1 = arith.constant 0 : i32
    return %arg0, %c0_i32, %c0_i32_0 : i32, i32, i32
  }
  func.func @transform_2(%arg0: i32) -> (i32, i32, i32) {
    %c0_i32 = arith.constant 0 : i32
    %c0_i32_0 = arith.constant 0 : i32
    %c0_i32_1 = arith.constant 0 : i32
    return %arg0, %c0_i32, %c0_i32_0 : i32, i32, i32
  }
  func.func @transform_3(%arg0: i32) -> (i32, i32, i32) {
    %c0_i32 = arith.constant 0 : i32
    %c0_i32_0 = arith.constant 0 : i32
    %c0_i32_1 = arith.constant 0 : i32
    return %arg0, %c0_i32, %c0_i32_0 : i32, i32, i32
  }
  func.func @transform_4(%arg0: i32) -> (i32, i32) {
    %c0_i32 = arith.constant 0 : i32
    %c0_i32_0 = arith.constant 0 : i32
    %c0_i32_1 = arith.constant 0 : i32
    return %c0_i32, %c0_i32_0 : i32, i32
  }
  func.func @transform_5(%arg0: i32) -> (i32, i32) {
    %c0_i32 = arith.constant 0 : i32
    %c0_i32_0 = arith.constant 0 : i32
    %c0_i32_1 = arith.constant 0 : i32
    return %c0_i32, %c0_i32_0 : i32, i32
  }
  func.func @transform_6(%arg0: i32) -> (i32, i32) {
    %c0_i32 = arith.constant 0 : i32
    %c0_i32_0 = arith.constant 0 : i32
    %c0_i32_1 = arith.constant 0 : i32
    return %c0_i32, %c0_i32_0 : i32, i32
  }
}

</mosaic_0001>

<bundles_post_ra>
// kernel: birnn_forward.1
= control target key start
LH: loop header
LB: loop body
LE: loop exit
PB: predicated region body
PF: predicated region fallthrough
CT: control target
= control target key end

     0   :  { %11 = vsyncpa [#allocation5], 0  ;;  %s3264_s0 = inlined_call_operand.vmem [shape: bf16[64,128], index: 0, kind: input, shape index: {}]   ;;  %s3265_s1 = inlined_call_operand.hbm [shape: bf16[2,128,256], index: 1, kind: input, shape index: {}]   ;;  %s3266_s2 = inlined_call_operand.vmem [shape: bf16[2,64,256], index: 2, kind: input, shape index: {}]   ;;  %s3267_s3 = inlined_call_operand.vmem [shape: f32[2,1,256], index: 3, kind: input, shape index: {}]   ;;  %s3268_s4 = inlined_call_operand.hbm [shape: bf16[128,128], index: 4, kind: input, shape index: {}]   ;;  %s3269_s5 = inlined_call_operand.vmem [shape: f32[1,128], index: 5, kind: input, shape index: {}]   ;;  %s3270_s6 = inlined_call_operand.hbm [shape: f32[8,128], index: 6, kind: output, shape index: {}]  }
   0x1   :  { %13 = vsyncpa [#allocation5 + $0x1], 0 }
   0x2   :  { %14 = vsyncpa [#allocation8], 0 }
   0x3   :  { %15 = vsyncpa [#allocation6], 0  ;;  %s2848_s21 = smov 0   ;;  %s2850_s22 = smov 0  }
   0x4   :  { %s2852_s23 = smov 0   ;;  %s2854_s24 = smov 0  }
   0x5 LB: > { %s2867_s25 = sadd.s32 4294967295, %s2794_s24   ;;  %p62_p0 = scmp.ne.s32.totalorder %s2786_s22, %s2782_s21  ;;  %s2794_s24 = sphi %s2854_s24, %s3286_s24   ;;  %s2790_s23 = sphi %s2852_s23, %s3285_s23   ;;  %s2786_s22 = sphi %s2850_s22, %s3284_s22   ;;  %s2782_s21 = sphi %s2848_s21, %s3283_s21  }
   0x6   : > { %p3271_p1 = scmp.eq.s32.totalorder %s2867_s25, 0  ;;  %p2197_p2 = scmp.ge.s32.totalorder %s2794_s24, 1 }
   0x7   : > { %p188_p3 = scmp.lt.s32.totalorder %s2794_s24, 3  ;;  %s2796_s28 = smov [#allocation7]  }
   0x8   : > { %p2876_p5 = por %p3271_p1, %p62_p0  ;;  %s203_s29 = sshll.u32 %s2796_s28, 4  ;;  %s204_s29 = int_to_ptr.vmem [resolvable:$true] %s203_s29 }
   0x9   : > { %p2880_p6 = pnand %p2197_p2, %p188_p3  ;;  %s2893_s7 = sadd.s32 1, %s2794_s24  }
   0xa   : > { %s3274_s26 = scalar_select %p2876_p5, 1, 0 }
   0xb   : > { %s3275_s27 = scalar_select %p2880_p6, 1, 0 }
   0xc   : > { %p2409_p7 = pneg %p2880_p6  ;;  %s49_s8 = sadd.s32 1, %s2790_s23 }
   0xd   : > { %s46_s9 = ssub.s32 %s2794_s24, %s2893_s7  ;;  %s2685_s10 = scalar_lea.vmem %s204_s29, 1024 }
   0xe   : > { %p2888_p8 = pnand %p2409_p7, %p3271_p1  ;;  %p2686_p10 = scmp.ne.s32.totalorder %s204_s29, %s2685_s10 }
   0xf   : > { %p2693_p13 = scmp.lt.s32.totalorder %s204_s29, %s204_s29  ;;  %p2694_p0 = scmp.lt.s32.totalorder %s2685_s10, %s2685_s10 }
  0x10   : > { %p2676_p9 = pneg %p2888_p8 }
  0x11   : > { %p2695_p2 = por %p2694_p0, %p2693_p13 }
  0x12   : > { %p2688_p11 = pnand %p2686_p10, %p2676_p9 }
  0x14   : > { %p2689_p12 = pneg %p2688_p11 }
  0x16   : > { %p2696_p3 = pnand %p2695_p2, %p2689_p12 }
  0x18   : > { %2699 = shalt.err (!%p2696_p3)
}
  0x19   : > { %s2797_s11 = smov 64   ;;  %s2798_s12 = smov 4  }
  0x1a   : > { %2412 = dma.hbm_to_vmem [thread:$0]  (!%p2888_p8), %s3268_s4, 1024, %s204_s29, [#allocation8], %s2797_s11, %s2797_s11, %s2798_s12  }
  0x1b   : > { %p47_p7 = scmp.eq.s32.totalorder %s46_s9, 0  ;;  %p56_p9 = scmp.ne.s32.totalorder %s2790_s23, %s2786_s22 }
  0x1c   : > { %p57_p10 = scmp.eq.s32.totalorder %s2794_s24, 0  ;;  %p2418_p11 = scmp.lt.s32.totalorder %s2794_s24, 2 }
  0x1d   : > { %s2910_s15 = scalar_select %p47_p7, %s2790_s23, %s49_s8  }
  0x1e   : > { %p58_p12 = por %p57_p10, %p56_p9  ;;  %s220_s16 = sand.u32 1, %s2790_s23  }
  0x1f   : > { %s2200_s17 = sshll.u32 %s220_s16, 7  ;;  %s2344_s18 = sshll.u32 %s2794_s24, 11 }
  0x20   : > { %s2917_s21 = scalar_lea.hbm %s3265_s1, %s2344_s18  ;;  %s224_s28 = scalar_lea.vmem [#allocation4], %s2200_s17 }
  0x21   : > { %s231_s29 = sshll.u32 %s224_s28, 4  ;;  %p2921_p8 = pnand %p2418_p11, %p58_p12  ;;  %s2919_s29 = int_to_ptr.vmem [resolvable:$true] %s231_s29 }
  0x22   : > { %s2925_s8 = scalar_lea.sflag [#allocation5], %s220_s16  ;;  %s2700_s24 = scalar_lea.hbm %s2917_s21, 2048 }
  0x23   : > { %p2701_p13 = scmp.ne.s32.totalorder %s2917_s21, %s2700_s24  ;;  %p2702_p0 = pneg %p2921_p8 }
  0x24   : > { %s2705_s11 = scalar_lea.hbm %s3265_s1, 4096  ;;  %p2706_p7 = scmp.lt.s32.totalorder %s2917_s21, %s3265_s1 }
  0x25   : > { %p2703_p2 = pnand %p2702_p0, %p2701_p13  ;;  %p2707_p9 = scmp.lt.s32.totalorder %s2705_s11, %s2700_s24 }
  0x27   : > { %p2704_p3 = pneg %p2703_p2  ;;  %p2708_p10 = por %p2707_p9, %p2706_p7 }
  0x29   : > { %p2709_p11 = pnand %p2708_p10, %p2704_p3 }
  0x2b   : > { %2712 = shalt.err (!%p2709_p11)
}
  0x2c   : > { %s2713_s14 = scalar_lea.vmem %s2919_s29, 2048  ;;  %s2799_s16 = smov [#allocation4]  }
  0x2d   : > { %p2714_p12 = scmp.ne.s32.totalorder %s2919_s29, %s2713_s14  ;;  %s2718_s17 = sshll.u32 %s2799_s16, 4  ;;  %s2719_s17 = int_to_ptr.vmem [resolvable:$false] %s2718_s17 }
  0x2e   : > { %s2720_s18 = scalar_lea.vmem %s2719_s17, 4096  ;;  %p2721_p2 = scmp.lt.s32.totalorder %s2919_s29, %s2719_s17 }
  0x2f   : > { %p2716_p4 = pnand %p2714_p12, %p2702_p0  ;;  %p2722_p1 = scmp.lt.s32.totalorder %s2720_s18, %s2713_s14 }
  0x31   : > { %p2717_p13 = pneg %p2716_p4  ;;  %p2723_p5 = por %p2722_p1, %p2721_p2 }
  0x33   : > { %p2724_p6 = pnand %p2723_p5, %p2717_p13 }
  0x35   : > { %2727 = shalt.err (!%p2724_p6)
}
  0x36   : > { %s2800_s19 = smov 128   ;;  %s2801_s20 = smov 8  }
  0x37   : > { %2416 = dma.hbm_to_vmem [thread:$0]  (!%p2921_p8), %s2917_s21, 2048, %s2919_s29, %s2925_s8, %s2800_s19, %s2800_s19, %s2801_s20  }
  0x38   : > { %p3278_p0 = scmp.ne.s32.totalorder %s3275_s27, 0 }
  0x39   : > { %s260_s28 = sand.u32 (!%p3278_p0), 1, %s2786_s22   ;;  %p3279_p1 = scmp.ne.s32.totalorder (!%p3278_p0), %s3274_s26, 0 }
  0x3a   : > { %258 = sbr.rel (%p3278_p0) target bundleno = 6768 (0x1a70), region = 44  ;;  %s2204_s24 = sshll.u32 (!%p3278_p0), %s260_s28, 7 }
  0x3b   : > { %s261_s9 = scalar_lea.sflag (!%p3278_p0), [#allocation5], %s260_s28  ;;  %s2949_s10 = scalar_lea.vmem (!%p3278_p0), [#allocation4], %s2204_s24 }
  0x3f   : > { %2769 = dma.done.wait (%p3279_p1), %s261_s9, 2048  }
  0x40   : > { %2771 = vsyncadd (%p3279_p1), %s261_s9, 4294965248  ;;  %p3280_p4 = scmp.eq.s32.totalorder %s2867_s25, 0 }
  0x42   : > { %2773 = dma.done.wait (%p3280_p4), [#allocation8], 1024   ;;  %p3281_p5 = pmov %p3280_p4 }
  0x43   : > { %p301_p6 = scmp.lt.s32.totalorder %s2867_s25, 1  ;;  %p3282_p8 = scmp.ne.s32.totalorder %s2867_s25, 0 }
  0x44   : > { %2775 = vsyncadd (%p3281_p5), [#allocation8], 4294966272 }
  0x45   : > { %s302_s27 = scalar_select %p301_p6, %s2867_s25, 1 }
  0x46   : > { %314 = sbr.rel (%p3282_p8) target bundleno = 319 (0x13f), region = 56 }
  0x47   : > { %s2345_s21 = sshll.u32 %s302_s27, 6  ;;  %s2208_s29 = sshll.u32 %s302_s27, 1 }
  0x48   : > { %s2964_s11 = scalar_lea.vmem %s3266_s2, %s2345_s21  ;;  %s2969_s13 = scalar_lea.vmem %s3267_s3, %s2208_s29 }
  0x4b   : > { %v2470_v0 = vld [vmem:[%s2949_s10 + $0x74] ss:$8 sps:$4 sm:$0xff]   ;;  %v2472_v1 = vld [vmem:[%s2949_s10 + $0x70] ss:$8 sps:$4 sm:$0xff]   ;;  %v2802_v2 = vmov 0   ;;  %v2494_v17 = vld [vmem:[%s3264_s0] sm:$0xff]   ;;  %v341_v21 = vlaneseq }
  0x4c   : > { %487 = vmatprep.mubr.bf16.mxu0 %v2802_v2  ;;  %507 = vmatprep.mubr.bf16.mxu1 %v2802_v2  ;;  %v2473_v3 = vld [vmem:[%s2949_s10 + $0x64] ss:$8 sps:$4 sm:$0xff]   ;;  %v2475_v4 = vld [vmem:[%s2949_s10 + $0x60] ss:$8 sps:$4 sm:$0xff]   ;;  %v2476_v5 = vld [vmem:[%s2949_s10 + $0x54] ss:$8 sps:$4 sm:$0xff]  }
  0x4d   : > { %455 = vmatprep.subr.bf16.mxu0 %v2470_v0  ;;  %2375 = vmatprep.subr.bf16.mxu1 %v2470_v0  ;;  %v2478_v6 = vld [vmem:[%s2949_s10 + $0x50] ss:$8 sps:$4 sm:$0xff]   ;;  %v2479_v7 = vld [vmem:[%s2949_s10 + $0x44] ss:$8 sps:$4 sm:$0xff]   ;;  %v2481_v8 = vld [vmem:[%s2949_s10 + $0x40] ss:$8 sps:$4 sm:$0xff]  }
  0x4e   : > { %456 = vmatpush1.bf16.msra.mxu0 %v2472_v1  ;;  %2383 = vmatpush1.bf16.msra.mxu1 %v2472_v1  ;;  %v2482_v9 = vld [vmem:[%s2949_s10 + $0x34] ss:$8 sps:$4 sm:$0xff]   ;;  %v2484_v10 = vld [vmem:[%s2949_s10 + $0x30] ss:$8 sps:$4 sm:$0xff]   ;;  %v2485_v11 = vld [vmem:[%s2949_s10 + $0x24] ss:$8 sps:$4 sm:$0xff]  }
  0x4f   : > { %457 = vmatprep.subr.bf16.mxu0 %v2473_v3  ;;  %2376 = vmatprep.subr.bf16.mxu1 %v2473_v3  ;;  %v2487_v12 = vld [vmem:[%s2949_s10 + $0x20] ss:$8 sps:$4 sm:$0xff]   ;;  %v2488_v13 = vld [vmem:[%s2949_s10 + $0x14] ss:$8 sps:$4 sm:$0xff]   ;;  %v2490_v14 = vld [vmem:[%s2949_s10 + $0x10] ss:$8 sps:$4 sm:$0xff]  }
  0x50   : > { %v2491_v15 = vld [vmem:[%s2949_s10 + $0x4] ss:$8 sps:$4 sm:$0xff]   ;;  %v2493_v16 = vld [vmem:[%s2949_s10] ss:$8 sps:$4 sm:$0xff]   ;;  %v2495_v18 = vld [vmem:[%s3264_s0 + $0x10] sm:$0xff]   ;;  %v342_v22 = vshrl.u32 %v341_v21, 7 }
  0x51   : > { %v2496_v19 = vld [vmem:[%s3264_s0 + $0x8] sm:$0xff]   ;;  %v2497_v20 = vld [vmem:[%s3264_s0 + $0x18] sm:$0xff]   ;;  %v339_v24 = vld [vmem:[%s2969_s13] sm:$0x3] }
  0x52   : > { %458 = vmatpush1.bf16.msra.mxu0 %v2475_v4  ;;  %2384 = vmatpush1.bf16.msra.mxu1 %v2475_v4  ;;  %v343_v23 = vsub.s32 0, %v342_v22  ;;  %v347_v25 = vsub.s32 1, %v342_v22 }
  0x53   : > { %459 = vmatprep.subr.bf16.mxu0 %v2476_v5  ;;  %2377 = vmatprep.subr.bf16.mxu1 %v2476_v5 }
  0x54   : > { %v344_v26 = vrot.slane %v339_v24, %v343_v23  ;;  %v348_v27 = vrot.slane %v339_v24, %v347_v25 }
  0x56   : > { %460 = vmatpush1.bf16.msra.mxu0 %v2478_v6  ;;  %2385 = vmatpush1.bf16.msra.mxu1 %v2478_v6 }
  0x57   : > { %461 = vmatprep.subr.bf16.mxu0 %v2479_v7  ;;  %2378 = vmatprep.subr.bf16.mxu1 %v2479_v7 }
  0x5a   : > { %462 = vmatpush1.bf16.msra.mxu0 %v2481_v8  ;;  %2386 = vmatpush1.bf16.msra.mxu1 %v2481_v8 }
  0x5b   : > { %463 = vmatprep.subr.bf16.mxu0 %v2482_v9  ;;  %2379 = vmatprep.subr.bf16.mxu1 %v2482_v9 }
  0x5e   : > { %464 = vmatpush1.bf16.msra.mxu0 %v2484_v10  ;;  %2387 = vmatpush1.bf16.msra.mxu1 %v2484_v10 }
  0x5f   : > { %465 = vmatprep.subr.bf16.mxu0 %v2485_v11  ;;  %2380 = vmatprep.subr.bf16.mxu1 %v2485_v11 }
  0x62   : > { %466 = vmatpush1.bf16.msra.mxu0 %v2487_v12  ;;  %2388 = vmatpush1.bf16.msra.mxu1 %v2487_v12 }
  0x63   : > { %467 = vmatprep.subr.bf16.mxu0 %v2488_v13  ;;  %2381 = vmatprep.subr.bf16.mxu1 %v2488_v13 }
  0x66   : > { %468 = vmatpush1.bf16.msra.mxu0 %v2490_v14  ;;  %2389 = vmatpush1.bf16.msra.mxu1 %v2490_v14 }
  0x67   : > { %469 = vmatprep.subr.bf16.mxu0 %v2491_v15  ;;  %2382 = vmatprep.subr.bf16.mxu1 %v2491_v15 }
  0x6a   : > { %470 = vmatpush1.bf16.msra.mxu0 %v2493_v16  ;;  %2390 = vmatpush1.bf16.msra.mxu1 %v2493_v16 }
  0x6d   : > { %488 = vmatmul.mubr.bf16.vlgmr.msra.gmra.mxu0 %v2494_v17  ;;  %508 = vmatmul.mubr.bf16.vlgmr.msra.gmra.mxu1 %v2495_v18 }
  0x6e   : > { %497 = vmatprep.mubr.bf16.mxu0 %v2802_v2  ;;  %517 = vmatprep.mubr.bf16.mxu1 %v2802_v2 }
  0x75   : > { %498 = vmatmul.mubr.bf16.gmra.mxu0 %v2496_v19  ;;  %518 = vmatmul.mubr.bf16.gmra.mxu1 %v2497_v20 }
 0x12d   : > { %v489_v28 = vpop.f32.mrf.mxu0  ;;  %v509_v29 = vpop.f32.mrf.mxu1 }
 0x12e   : > { %v490_v30 = vadd.f32 %v489_v28, %v344_v26  ;;  %v510_v31 = vadd.f32 %v509_v29, %v344_v26 }
 0x12f   : > { %v491_v32 = vpop.f32.mrf.mxu0  ;;  %v511_v33 = vpop.f32.mrf.mxu1 }
 0x130   : > { %528 = vst [vmem:[#allocation2 + $0x30] sm:$0xff] %v490_v30  ;;  %536 = vst [vmem:[#allocation2 + $0x40] sm:$0xff] %v510_v31  ;;  %v492_v34 = vadd.f32 %v491_v32, %v348_v27  ;;  %v512_v35 = vadd.f32 %v511_v33, %v348_v27 }
 0x131   : > { %v493_v36 = vpop.f32.mrf.mxu0  ;;  %v513_v37 = vpop.f32.mrf.mxu1 }
 0x132   : > { %529 = vst [vmem:[#allocation2] sm:$0xff] %v492_v34  ;;  %537 = vst [vmem:[#allocation2 + $0x20] sm:$0xff] %v512_v35  ;;  %v494_v38 = vadd.f32 %v493_v36, %v344_v26  ;;  %v514_v39 = vadd.f32 %v513_v37, %v344_v26 }
 0x133   : > { %v495_v40 = vpop.f32.mrf.mxu0  ;;  %v515_v41 = vpop.f32.mrf.mxu1 }
 0x134   : > { %530 = vst [vmem:[#allocation2 + $0x58] sm:$0xff] %v494_v38  ;;  %538 = vst [vmem:[#allocation2 + $0x10] sm:$0xff] %v514_v39  ;;  %v496_v42 = vadd.f32 %v495_v40, %v348_v27  ;;  %v516_v43 = vadd.f32 %v515_v41, %v348_v27 }
 0x135   : > { %v499_v44 = vpop.f32.mrf.mxu0  ;;  %v519_v45 = vpop.f32.mrf.mxu1 }
 0x136   : > { %531 = vst [vmem:[#allocation2 + $0x18] sm:$0xff] %v496_v42  ;;  %539 = vst [vmem:[#allocation2 + $0x38] sm:$0xff] %v516_v43  ;;  %v500_v46 = vadd.f32 %v499_v44, %v344_v26  ;;  %v520_v47 = vadd.f32 %v519_v45, %v344_v26 }
 0x137   : > { %v501_v48 = vpop.f32.mrf.mxu0  ;;  %v521_v49 = vpop.f32.mrf.mxu1 }
 0x138   : > { %532 = vst [vmem:[#allocation2 + $0x50] sm:$0xff] %v500_v46  ;;  %540 = vst [vmem:[#allocation2 + $0x60] sm:$0xff] %v520_v47  ;;  %v502_v50 = vadd.f32 %v501_v48, %v348_v27  ;;  %v522_v51 = vadd.f32 %v521_v49, %v348_v27 }
 0x139   : > { %v503_v52 = vpop.f32.mrf.mxu0  ;;  %v523_v53 = vpop.f32.mrf.mxu1 }
 0x13a   : > { %533 = vst [vmem:[#allocation2 + $0x68] sm:$0xff] %v502_v50  ;;  %541 = vst [vmem:[#allocation2 + $0x70] sm:$0xff] %v522_v51  ;;  %v504_v54 = vadd.f32 %v503_v52, %v344_v26  ;;  %v524_v55 = vadd.f32 %v523_v53, %v344_v26 }
 0x13b   : > { %v505_v56 = vpop.f32.mrf.mxu0  ;;  %v525_v57 = vpop.f32.mrf.mxu1 }
 0x13c   : > { %534 = vst [vmem:[#allocation2 + $0x8] sm:$0xff] %v504_v54  ;;  %542 = vst [vmem:[#allocation2 + $0x78] sm:$0xff] %v524_v55  ;;  %v506_v58 = vadd.f32 %v505_v56, %v348_v27  ;;  %v526_v59 = vadd.f32 %v525_v57, %v348_v27 }
 0x13e   : > { %535 = vst [vmem:[#allocation2 + $0x48] sm:$0xff] %v506_v58  ;;  %543 = vst [vmem:[#allocation2 + $0x28] sm:$0xff] %v526_v59 }
 0x13f PF: > { %p2230_p3 = scmp.le.s32.totalorder %s2867_s25, 0 }
 0x141   : > { %547 = sbr.rel (%p2230_p3) target bundleno = 554 (0x22a), region = 60 }
 0x146   : > { %v2498_v60 = vld [vmem:[%s2949_s10 + $0x34] ss:$8 sps:$4 sm:$0xff]   ;;  %v2500_v61 = vld [vmem:[%s2949_s10 + $0x30] ss:$8 sps:$4 sm:$0xff]   ;;  %v2803_v62 = vmov 0   ;;  %v548_v5 = vld [vmem:[#allocation3] sm:$0xff]  ;;  %v570_v17 = vlaneseq }
 0x147   : > { %665 = vmatprep.mubr.bf16.mxu0 %v2803_v62  ;;  %685 = vmatprep.mubr.bf16.mxu1 %v2803_v62  ;;  %v2501_v63 = vld [vmem:[%s2949_s10 + $0x24] ss:$8 sps:$4 sm:$0xff]   ;;  %v2503_v0 = vld [vmem:[%s2949_s10 + $0x20] ss:$8 sps:$4 sm:$0xff]   ;;  %v2504_v1 = vld [vmem:[%s2949_s10 + $0x14] ss:$8 sps:$4 sm:$0xff]  }
 0x148   : > { %641 = vmatprep.subr.bf16.mxu0 %v2498_v60  ;;  %2391 = vmatprep.subr.bf16.mxu1 %v2498_v60  ;;  %v2506_v2 = vld [vmem:[%s2949_s10 + $0x10] ss:$8 sps:$4 sm:$0xff]   ;;  %v2507_v3 = vld [vmem:[%s2949_s10 + $0x4] ss:$8 sps:$4 sm:$0xff]   ;;  %v2509_v4 = vld [vmem:[%s2949_s10] ss:$8 sps:$4 sm:$0xff]  }
 0x149   : > { %642 = vmatpush1.bf16.msra.mxu0 %v2500_v61  ;;  %2395 = vmatpush1.bf16.msra.mxu1 %v2500_v61  ;;  %v549_v6 = vld [vmem:[#allocation3 + $0x8] sm:$0xff]  ;;  %v552_v7 = vld [vmem:[#allocation3 + $0x20] sm:$0xff]  ;;  %vm620_vm0 = vcmask 523264   ;;  %v550_v11 = vld [vmem:[#allocation3 + $0x10] sm:$0xff]  ;;  %v571_v18 = vshrl.u32 %v570_v17, 7 }
 0x14a   : > { %643 = vmatprep.subr.bf16.mxu0 %v2501_v63  ;;  %2392 = vmatprep.subr.bf16.mxu1 %v2501_v63  ;;  %v553_v8 = vld [vmem:[#allocation3 + $0x28] sm:$0xff]  ;;  %v556_v9 = vpack.c.bf16 %v549_v6, %v548_v5  ;;  %v551_v12 = vld [vmem:[#allocation3 + $0x18] sm:$0xff]  ;;  %v554_v13 = vld [vmem:[#allocation3 + $0x30] sm:$0xff] }
 0x14b   : > { %v558_v10 = vpack.c.bf16 %v553_v8, %v552_v7  ;;  %v555_v14 = vld [vmem:[#allocation3 + $0x38] sm:$0xff]  ;;  %v557_v15 = vpack.c.bf16 %v551_v12, %v550_v11  ;;  %v572_v19 = vsub.s32 0, %v571_v18  ;;  %v568_v20 = vld [vmem:[%s2969_s13] sm:$0x3]  ;;  %v576_v21 = vsub.s32 1, %v571_v18 }
 0x14c   : > { %v559_v16 = vpack.c.bf16 %v555_v14, %v554_v13 }
 0x14d   : > { %644 = vmatpush1.bf16.msra.mxu0 %v2503_v0  ;;  %2396 = vmatpush1.bf16.msra.mxu1 %v2503_v0  ;;  %v573_v22 = vrot.slane %v568_v20, %v572_v19  ;;  %v577_v23 = vrot.slane %v568_v20, %v576_v21 }
 0x14e   : > { %645 = vmatprep.subr.bf16.mxu0 %v2504_v1  ;;  %2393 = vmatprep.subr.bf16.mxu1 %v2504_v1 }
 0x151   : > { %646 = vmatpush1.bf16.msra.mxu0 %v2506_v2  ;;  %2397 = vmatpush1.bf16.msra.mxu1 %v2506_v2 }
 0x152   : > { %647 = vmatprep.subr.bf16.mxu0 %v2507_v3  ;;  %2394 = vmatprep.subr.bf16.mxu1 %v2507_v3 }
 0x155   : > { %648 = vmatpush1.bf16.msra.mxu0 %v2509_v4  ;;  %2398 = vmatpush1.bf16.msra.mxu1 %v2509_v4 }
 0x158   : > { %2239 = vmatmul.mubr.msk.bf16.vlgmr.msra.gmra.mxu0 %vm620_vm0, %v556_v9  ;;  %2241 = vmatmul.mubr.msk.bf16.vlgmr.msra.gmra.mxu1 %vm620_vm0, %v558_v10 }
 0x159   : > { %675 = vmatprep.mubr.bf16.mxu0 %v2803_v62  ;;  %695 = vmatprep.mubr.bf16.mxu1 %v2803_v62 }
 0x160   : > { %2240 = vmatmul.mubr.msk.bf16.gmra.mxu0 %vm620_vm0, %v557_v15  ;;  %2242 = vmatmul.mubr.msk.bf16.gmra.mxu1 %vm620_vm0, %v559_v16 }
 0x218   : > { %v667_v24 = vpop.f32.mrf.mxu0  ;;  %v687_v25 = vpop.f32.mrf.mxu1 }
 0x219   : > { %v668_v26 = vadd.f32 %v667_v24, %v573_v22  ;;  %v688_v27 = vadd.f32 %v687_v25, %v573_v22 }
 0x21a   : > { %v669_v28 = vpop.f32.mrf.mxu0  ;;  %v689_v29 = vpop.f32.mrf.mxu1 }
 0x21b   : > { %706 = vst [vmem:[#allocation2 + $0x30] sm:$0xff] %v668_v26  ;;  %714 = vst [vmem:[#allocation2 + $0x40] sm:$0xff] %v688_v27  ;;  %v670_v30 = vadd.f32 %v669_v28, %v577_v23  ;;  %v690_v31 = vadd.f32 %v689_v29, %v577_v23 }
 0x21c   : > { %v671_v32 = vpop.f32.mrf.mxu0  ;;  %v691_v33 = vpop.f32.mrf.mxu1 }
 0x21d   : > { %707 = vst [vmem:[#allocation2] sm:$0xff] %v670_v30  ;;  %715 = vst [vmem:[#allocation2 + $0x20] sm:$0xff] %v690_v31  ;;  %v672_v34 = vadd.f32 %v671_v32, %v573_v22  ;;  %v692_v35 = vadd.f32 %v691_v33, %v573_v22 }
 0x21e   : > { %v673_v36 = vpop.f32.mrf.mxu0  ;;  %v693_v37 = vpop.f32.mrf.mxu1 }
 0x21f   : > { %708 = vst [vmem:[#allocation2 + $0x58] sm:$0xff] %v672_v34  ;;  %716 = vst [vmem:[#allocation2 + $0x10] sm:$0xff] %v692_v35  ;;  %v674_v38 = vadd.f32 %v673_v36, %v577_v23  ;;  %v694_v39 = vadd.f32 %v693_v37, %v577_v23 }
 0x220   : > { %v677_v40 = vpop.f32.mrf.mxu0  ;;  %v697_v41 = vpop.f32.mrf.mxu1 }
 0x221   : > { %709 = vst [vmem:[#allocation2 + $0x18] sm:$0xff] %v674_v38  ;;  %717 = vst [vmem:[#allocation2 + $0x38] sm:$0xff] %v694_v39  ;;  %v678_v42 = vadd.f32 %v677_v40, %v573_v22  ;;  %v698_v43 = vadd.f32 %v697_v41, %v573_v22 }
 0x222   : > { %v679_v44 = vpop.f32.mrf.mxu0  ;;  %v699_v45 = vpop.f32.mrf.mxu1 }
 0x223   : > { %710 = vst [vmem:[#allocation2 + $0x50] sm:$0xff] %v678_v42  ;;  %718 = vst [vmem:[#allocation2 + $0x60] sm:$0xff] %v698_v43  ;;  %v680_v46 = vadd.f32 %v679_v44, %v577_v23  ;;  %v700_v47 = vadd.f32 %v699_v45, %v577_v23 }
 0x224   : > { %v681_v48 = vpop.f32.mrf.mxu0  ;;  %v701_v49 = vpop.f32.mrf.mxu1 }
 0x225   : > { %711 = vst [vmem:[#allocation2 + $0x68] sm:$0xff] %v680_v46  ;;  %719 = vst [vmem:[#allocation2 + $0x70] sm:$0xff] %v700_v47  ;;  %v682_v50 = vadd.f32 %v681_v48, %v573_v22  ;;  %v702_v51 = vadd.f32 %v701_v49, %v573_v22 }
 0x226   : > { %v683_v52 = vpop.f32.mrf.mxu0  ;;  %v703_v53 = vpop.f32.mrf.mxu1 }
 0x227   : > { %712 = vst [vmem:[#allocation2 + $0x8] sm:$0xff] %v682_v50  ;;  %720 = vst [vmem:[#allocation2 + $0x78] sm:$0xff] %v702_v51  ;;  %v684_v54 = vadd.f32 %v683_v52, %v577_v23  ;;  %v704_v55 = vadd.f32 %v703_v53, %v577_v23 }
 0x229   : > { %713 = vst [vmem:[#allocation2 + $0x48] sm:$0xff] %v684_v54  ;;  %721 = vst [vmem:[#allocation2 + $0x28] sm:$0xff] %v704_v55 }
 0x22a PF: > { %v3013_v56 = vld [vmem:[%s2964_s11 + $0x34] ss:$8 sps:$4 sm:$0xff]   ;;  %v3016_v57 = vld [vmem:[%s2964_s11 + $0x30] ss:$8 sps:$4 sm:$0xff]   ;;  %v2804_v58 = vmov 0   ;;  %v2805_v1 = vmov 0.0|0.0  }
 0x22b   : > { %809 = vmatprep.mubr.bf16.mxu0 %v2804_v58  ;;  %967 = vmatprep.mubr.bf16.mxu1 %v2804_v58  ;;  %v3022_v59 = vld [vmem:[%s2964_s11 + $0x24] ss:$8 sps:$4 sm:$0xff]   ;;  %v3027_v60 = vld [vmem:[%s2964_s11 + $0x20] ss:$8 sps:$4 sm:$0xff]   ;;  %v3032_v61 = vld [vmem:[%s2964_s11 + $0x14] ss:$8 sps:$4 sm:$0xff]  }
 0x22c   : > { %785 = vmatprep.subr.bf16.mxu0 %v3013_v56  ;;  %943 = vmatprep.subr.bf16.mxu1 %v3013_v56  ;;  %v3036_v62 = vld [vmem:[%s2964_s11 + $0x10] ss:$8 sps:$4 sm:$0xff]   ;;  %v3042_v63 = vld [vmem:[%s2964_s11 + $0x4] ss:$8 sps:$4 sm:$0xff]   ;;  %v3047_v0 = vld [vmem:[%s2964_s11] ss:$8 sps:$4 sm:$0xff]  }
 0x22d   : > { %786 = vmatpush1.bf16.msra.mxu0 %v3016_v57  ;;  %944 = vmatpush1.bf16.msra.mxu1 %v3016_v57  ;;  %v722_v2 = vld [vmem:[#allocation2 + $0x30] sm:$0xff]  ;;  %s2806_s9 = smov 32   ;;  %s2807_s10 = smov 64   ;;  %vm872_vm1 = vcmask 261120   ;;  %vm878_vm2 = vcmask 523520   ;;  %vm773_vm3 = vcmask 523264  }
 0x22e   : > { %787 = vmatprep.subr.bf16.mxu0 %v3022_v59  ;;  %945 = vmatprep.subr.bf16.mxu1 %v3022_v59  ;;  %s2808_s27 = smov 96   ;;  %v880_v40 = vld [vmem:[#allocation2 + $0x58] sm:$0xff]  ;;  %v881_v42 = vld [vmem:[#allocation2 + $0x70] sm:$0xff]  ;;  %p2330_p7 = scmp.ne.s32.totalorder %s2867_s25, 1 }
 0x22f   : > { %s2809_s21 = smov (!%p2330_p7), 64  }
 0x230   : > { %v723_v4 = vld [vmem:[#allocation2 + $0x28] sm:$0xff] }
 0x231   : > { %788 = vmatpush1.bf16.msra.mxu0 %v3027_v60  ;;  %946 = vmatpush1.bf16.msra.mxu1 %v3027_v60 }
 0x232   : > { %789 = vmatprep.subr.bf16.mxu0 %v3032_v61  ;;  %947 = vmatprep.subr.bf16.mxu1 %v3032_v61 }
 0x235   : > { %790 = vmatpush1.bf16.msra.mxu0 %v3036_v62  ;;  %948 = vmatpush1.bf16.msra.mxu1 %v3036_v62 }
 0x236   : > { %791 = vmatprep.subr.bf16.mxu0 %v3042_v63  ;;  %949 = vmatprep.subr.bf16.mxu1 %v3042_v63 }
 0x239   : > { %792 = vmatpush1.bf16.msra.mxu0 %v3047_v0  ;;  %950 = vmatpush1.bf16.msra.mxu1 %v3047_v0 }
 0x23a   : > { %1099 = vmatprep.subr.bf16.mxu0 %v3013_v56  ;;  %1255 = vmatprep.subr.bf16.mxu1 %v3013_v56 }
 0x23c   : > { %810 = vmatmul.mubr.bf16.vlgmr.msra.gmra.mxu0 %v2805_v1 }
 0x23d   : > { %1100 = vmatpush1.bf16.msra.mxu0 %v3016_v57  ;;  %1123 = vmatprep.mubr.bf16.mxu0 %v2804_v58 }
 0x23e   : > { %1101 = vmatprep.subr.bf16.mxu0 %v3022_v59 }
 0x241   : > { %1102 = vmatpush1.bf16.msra.mxu0 %v3027_v60 }
 0x242   : > { %1103 = vmatprep.subr.bf16.mxu0 %v3032_v61 }
 0x245   : > { %1104 = vmatpush1.bf16.msra.mxu0 %v3036_v62 }
 0x246   : > { %1105 = vmatprep.subr.bf16.mxu0 %v3042_v63 }
 0x249   : > { %1106 = vmatpush1.bf16.msra.mxu0 %v3047_v0 }
 0x24a   : > { %1411 = vmatprep.subr.bf16.mxu0 %v3013_v56 }
 0x2fc   : > { %v811_v3 = vpop.f32.mrf.mxu0 }
 0x2fd   : > { %v818_v5 = vadd.f32 %v811_v3, %v722_v2 }
 0x2fe   : > { %v813_v6 = vpop.f32.mrf.mxu0 }
 0x2ff   : > { %2534 = vtanh.f32 %v818_v5  ;;  %v819_v7 = vadd.f32 %v813_v6, %v723_v4  ;;  %v2251_v12 = vmul.f32 -1.442695, %v818_v5 }
 0x300   : > { %v815_v8 = vpop.f32.mrf.mxu0 }
 0x301   : > { %2536 = vtanh.f32 %v819_v7  ;;  %v2252_v13 = vmul.f32 -1.442695, %v819_v7 }
 0x302   : > { %v816_v9 = vpop.f32.mrf.mxu0  ;;  %2538 = vpow2.f32 %v2251_v12 }
 0x303   : > { %2540 = vpow2.f32 %v2252_v13 }
 0x30c   : > { %v2535_v10 = vpop.eup %2534 }
 0x30d   : > { %829 = vrot.lane.b32.xlu0 %v2535_v10, %s2806_s9 }
 0x30e   : > { %v2537_v11 = vpop.eup %2536 }
 0x30f   : > { %v2539_v14 = vpop.eup %2538 }
 0x310   : > { %v823_v15 = vadd.f32 1.0, %v2539_v14  ;;  %v2541_v16 = vpop.eup %2540 }
 0x311   : > { %853 = vrot.lane.b32.xlu0 %v2537_v11, %s2806_s9  ;;  %v847_v17 = vadd.f32 1.0, %v2541_v16 }
 0x312   : > { %2542 = vrcp.f32 %v823_v15 }
 0x313   : > { %2544 = vrcp.f32 %v847_v17 }
 0x31f   : > { %v2543_v18 = vpop.eup %2542 }
 0x320   : > { %v2545_v21 = vpop.eup %2544  ;;  %v827_v24 = vmul.f32 0.0, %v2543_v18 }
 0x321   : > { %v851_v27 = vmul.f32 0.0, %v2545_v21 }
 0x37f   : > { %v830_v19 = vpop.permute.xlu0 %829 }
 0x380   : > { %v832_v20 = vmul.f32 %v2543_v18, %v830_v19 }
 0x382   : > { %834 = vrot.lane.b32.xlu1 %v832_v20, %s2806_s9 }
 0x383   : > { %v854_v22 = vpop.permute.xlu0 %853 }
 0x384   : > { %v856_v23 = vmul.f32 %v2545_v21, %v854_v22 }
 0x386   : > { %858 = vrot.lane.b32.xlu1 %v856_v23, %s2806_s9  ;;  %v1036_v23 = vld [vmem:[#allocation2 + $0x50] sm:$0xff] }
 0x3f4   : > { %v835_v25 = vpop.permute.xlu1 %834 }
 0x3f5   : > { %v3069_v26 = vadd.f32 %v835_v25, %v827_v24  ;;  %v1037_v25 = vld [vmem:[#allocation2 + $0x38] sm:$0xff] }
 0x3f7   : > { %2546 = vtanh.f32 %v3069_v26 }
 0x3f8   : > { %v859_v28 = vpop.permute.xlu1 %858 }
 0x3f9   : > { %v3072_v29 = vadd.f32 %v859_v28, %v851_v27 }
 0x3fb   : > { %2548 = vtanh.f32 %v3072_v29 }
 0x404   : > { %v2547_v30 = vpop.eup %2546 }
 0x405   : > { %840 = vrot.lane.b32.xlu0 %v2547_v30, %s2806_s9 }
 0x408   : > { %v2549_v31 = vpop.eup %2548 }
 0x409   : > { %864 = vrot.lane.b32.xlu1 %v2549_v31, %s2806_s9 }
 0x477   : > { %v841_v32 = vpop.permute.xlu0 %840 }
 0x478   : > { %v843_v33 = vmul.f32 %v2543_v18, %v841_v32 }
 0x47a   : > { %869 = vrot.lane.b32.xlu0 %v843_v33, %s2807_s10 }
 0x47b   : > { %v865_v34 = vpop.permute.xlu1 %864 }
 0x47c   : > { %v867_v35 = vmul.f32 %v2545_v21, %v865_v34 }
 0x47e   : > { %875 = vrot.lane.b32.xlu1 %v867_v35, %s2808_s27 }
 0x4ec   : > { %v870_v36 = vpop.permute.xlu0 %869 }
 0x4ed   : > { %873 = vst.msk [vmem:[#allocation3] sm:$0xff] %vm872_vm1, %v870_v36 }
 0x4f0   : > { %v876_v37 = vpop.permute.xlu1 %875 }
 0x4f1   : > { %879 = vst.msk [vmem:[#allocation3 + $0x38] sm:$0xff] %vm878_vm2, %v876_v37  ;;  %v882_v38 = vsel %vm872_vm1, %v870_v36, %v876_v37 }
 0x4f2   : > { %v883_v39 = vpack.c.bf16 %v882_v38, %v882_v38 }
 0x4f4   : > { %2261 = vmatmul.mubr.msk.bf16.vlgmr.msra.gmra.mxu1 %vm773_vm3, %v883_v39 }
 0x4f5   : > { %1256 = vmatpush1.bf16.msra.mxu1 %v3016_v57  ;;  %1279 = vmatprep.mubr.bf16.mxu1 %v2804_v58 }
 0x4f6   : > { %1257 = vmatprep.subr.bf16.mxu1 %v3022_v59 }
 0x4f9   : > { %1258 = vmatpush1.bf16.msra.mxu1 %v3027_v60 }
 0x4fa   : > { %1259 = vmatprep.subr.bf16.mxu1 %v3032_v61 }
 0x4fd   : > { %1260 = vmatpush1.bf16.msra.mxu1 %v3036_v62 }
 0x4fe   : > { %1261 = vmatprep.subr.bf16.mxu1 %v3042_v63 }
 0x501   : > { %1262 = vmatpush1.bf16.msra.mxu1 %v3047_v0 }
 0x502   : > { %1567 = vmatprep.subr.bf16.mxu1 %v3013_v56 }
 0x5b4   : > { %v969_v41 = vpop.f32.mrf.mxu1 }
 0x5b5   : > { %v976_v43 = vadd.f32 %v969_v41, %v880_v40 }
 0x5b6   : > { %v971_v44 = vpop.f32.mrf.mxu1 }
 0x5b7   : > { %2550 = vtanh.f32 %v976_v43  ;;  %v977_v45 = vadd.f32 %v971_v44, %v881_v42  ;;  %v2262_v50 = vmul.f32 -1.442695, %v976_v43 }
 0x5b8   : > { %v973_v46 = vpop.f32.mrf.mxu1 }
 0x5b9   : > { %2552 = vtanh.f32 %v977_v45  ;;  %v2263_v51 = vmul.f32 -1.442695, %v977_v45 }
 0x5ba   : > { %v974_v47 = vpop.f32.mrf.mxu1  ;;  %2554 = vpow2.f32 %v2262_v50 }
 0x5bb   : > { %2556 = vpow2.f32 %v2263_v51 }
 0x5c4   : > { %v2551_v48 = vpop.eup %2550 }
 0x5c5   : > { %987 = vrot.lane.b32.xlu0 %v2551_v48, %s2806_s9 }
 0x5c6   : > { %v2553_v49 = vpop.eup %2552 }
 0x5c7   : > { %1011 = vrot.lane.b32.xlu1 %v2553_v49, %s2806_s9  ;;  %v2555_v52 = vpop.eup %2554 }
 0x5c8   : > { %v2557_v53 = vpop.eup %2556  ;;  %v981_v54 = vadd.f32 1.0, %v2555_v52 }
 0x5c9   : > { %v1005_v55 = vadd.f32 1.0, %v2557_v53 }
 0x5ca   : > { %2558 = vrcp.f32 %v981_v54 }
 0x5cb   : > { %2560 = vrcp.f32 %v1005_v55 }
 0x5d7   : > { %v2559_v1 = vpop.eup %2558 }
 0x5d8   : > { %v2561_v4 = vpop.eup %2560  ;;  %v985_v7 = vmul.f32 %v2559_v1, %v3069_v26 }
 0x5d9   : > { %v1009_v10 = vmul.f32 %v2561_v4, %v3072_v29 }
 0x637   : > { %v988_v2 = vpop.permute.xlu0 %987 }
 0x638   : > { %v990_v3 = vmul.f32 %v2559_v1, %v988_v2 }
 0x639   : > { %v1012_v5 = vpop.permute.xlu1 %1011 }
 0x63a   : > { %992 = vrot.lane.b32.xlu0 %v990_v3, %s2806_s9  ;;  %v1014_v6 = vmul.f32 %v2561_v4, %v1012_v5  ;;  %v1192_v5 = vld [vmem:[#allocation2 + $0x8] sm:$0xff] }
 0x63c   : > { %1016 = vrot.lane.b32.xlu1 %v1014_v6, %s2806_s9 }
 0x6ac   : > { %v993_v8 = vpop.permute.xlu0 %992 }
 0x6ad   : > { %v3097_v9 = vadd.f32 %v993_v8, %v985_v7  ;;  %v1193_v7 = vld [vmem:[#allocation2 + $0x20] sm:$0xff] }
 0x6ae   : > { %v1017_v11 = vpop.permute.xlu1 %1016 }
 0x6af   : > { %2562 = vtanh.f32 %v3097_v9  ;;  %v3101_v12 = vadd.f32 %v1017_v11, %v1009_v10 }
 0x6b1   : > { %2564 = vtanh.f32 %v3101_v12 }
 0x6bc   : > { %v2563_v13 = vpop.eup %2562 }
 0x6bd   : > { %998 = vrot.lane.b32.xlu0 %v2563_v13, %s2806_s9 }
 0x6be   : > { %v2565_v14 = vpop.eup %2564 }
 0x6bf   : > { %1022 = vrot.lane.b32.xlu1 %v2565_v14, %s2806_s9 }
 0x72f   : > { %v999_v15 = vpop.permute.xlu0 %998 }
 0x730   : > { %v1001_v16 = vmul.f32 %v2559_v1, %v999_v15 }
 0x731   : > { %v1023_v17 = vpop.permute.xlu1 %1022 }
 0x732   : > { %1027 = vrot.lane.b32.xlu0 %v1001_v16, %s2807_s10  ;;  %v1025_v18 = vmul.f32 %v2561_v4, %v1023_v17 }
 0x734   : > { %1032 = vrot.lane.b32.xlu1 %v1025_v18, %s2808_s27 }
 0x7a4   : > { %v1028_v19 = vpop.permute.xlu0 %1027 }
 0x7a5   : > { %1030 = vst.msk [vmem:[#allocation3 + $0x8] sm:$0xff] %vm872_vm1, %v1028_v19 }
 0x7a6   : > { %v1033_v20 = vpop.permute.xlu1 %1032 }
 0x7a7   : > { %1035 = vst.msk [vmem:[#allocation3 + $0x30] sm:$0xff] %vm878_vm2, %v1033_v20  ;;  %v1038_v21 = vsel %vm872_vm1, %v1028_v19, %v1033_v20 }
 0x7a8   : > { %v1039_v22 = vpack.c.bf16 %v1038_v21, %v1038_v21 }
 0x7aa   : > { %2272 = vmatmul.mubr.msk.bf16.vlgmr.msra.gmra.mxu0 %vm773_vm3, %v1039_v22 }
 0x7ab   : > { %1412 = vmatpush1.bf16.msra.mxu0 %v3016_v57  ;;  %1435 = vmatprep.mubr.bf16.mxu0 %v2804_v58 }
 0x7ac   : > { %1413 = vmatprep.subr.bf16.mxu0 %v3022_v59 }
 0x7af   : > { %1414 = vmatpush1.bf16.msra.mxu0 %v3027_v60 }
 0x7b0   : > { %1415 = vmatprep.subr.bf16.mxu0 %v3032_v61 }
 0x7b3   : > { %1416 = vmatpush1.bf16.msra.mxu0 %v3036_v62 }
 0x7b4   : > { %1417 = vmatprep.subr.bf16.mxu0 %v3042_v63 }
 0x7b7   : > { %1418 = vmatpush1.bf16.msra.mxu0 %v3047_v0 }
 0x7b8   : > { %1723 = vmatprep.subr.bf16.mxu0 %v3013_v56 }
 0x86a   : > { %v1125_v24 = vpop.f32.mrf.mxu0 }
 0x86b   : > { %v1132_v26 = vadd.f32 %v1125_v24, %v1036_v23 }
 0x86c   : > { %v1127_v27 = vpop.f32.mrf.mxu0 }
 0x86d   : > { %2566 = vtanh.f32 %v1132_v26  ;;  %v1133_v28 = vadd.f32 %v1127_v27, %v1037_v25  ;;  %v2273_v33 = vmul.f32 -1.442695, %v1132_v26 }
 0x86e   : > { %v1129_v29 = vpop.f32.mrf.mxu0 }
 0x86f   : > { %2568 = vtanh.f32 %v1133_v28  ;;  %v2274_v34 = vmul.f32 -1.442695, %v1133_v28 }
 0x870   : > { %v1130_v30 = vpop.f32.mrf.mxu0  ;;  %2570 = vpow2.f32 %v2273_v33 }
 0x871   : > { %2572 = vpow2.f32 %v2274_v34 }
 0x87a   : > { %v2567_v31 = vpop.eup %2566 }
 0x87b   : > { %1143 = vrot.lane.b32.xlu0 %v2567_v31, %s2806_s9 }
 0x87c   : > { %v2569_v32 = vpop.eup %2568 }
 0x87d   : > { %1167 = vrot.lane.b32.xlu1 %v2569_v32, %s2806_s9  ;;  %v2571_v56 = vpop.eup %2570 }
 0x87e   : > { %v2573_v35 = vpop.eup %2572  ;;  %v1137_v36 = vadd.f32 1.0, %v2571_v56 }
 0x87f   : > { %v1161_v37 = vadd.f32 1.0, %v2573_v35 }
 0x880   : > { %2574 = vrcp.f32 %v1137_v36 }
 0x881   : > { %2576 = vrcp.f32 %v1161_v37 }
 0x88d   : > { %v2575_v38 = vpop.eup %2574 }
 0x88e   : > { %v2577_v41 = vpop.eup %2576  ;;  %v1141_v44 = vmul.f32 %v2575_v38, %v3097_v9 }
 0x88f   : > { %v1165_v47 = vmul.f32 %v2577_v41, %v3101_v12 }
 0x8ed   : > { %v1144_v39 = vpop.permute.xlu0 %1143 }
 0x8ee   : > { %v1146_v40 = vmul.f32 %v2575_v38, %v1144_v39 }
 0x8ef   : > { %v1168_v42 = vpop.permute.xlu1 %1167 }
 0x8f0   : > { %1148 = vrot.lane.b32.xlu0 %v1146_v40, %s2806_s9  ;;  %v1170_v43 = vmul.f32 %v2577_v41, %v1168_v42  ;;  %v1348_v42 = vld [vmem:[#allocation2 + $0x40] sm:$0xff] }
 0x8f2   : > { %1172 = vrot.lane.b32.xlu1 %v1170_v43, %s2806_s9 }
 0x962   : > { %v1149_v45 = vpop.permute.xlu0 %1148 }
 0x963   : > { %v3126_v46 = vadd.f32 %v1149_v45, %v1141_v44  ;;  %v1349_v44 = vld [vmem:[#allocation2 + $0x48] sm:$0xff] }
 0x964   : > { %v1173_v48 = vpop.permute.xlu1 %1172 }
 0x965   : > { %2578 = vtanh.f32 %v3126_v46  ;;  %v1175_v49 = vadd.f32 %v1173_v48, %v1165_v47 }
 0x967   : > { %2580 = vtanh.f32 %v1175_v49 }
 0x972   : > { %v2579_v50 = vpop.eup %2578 }
 0x973   : > { %1154 = vrot.lane.b32.xlu0 %v2579_v50, %s2806_s9 }
 0x974   : > { %v2581_v51 = vpop.eup %2580 }
 0x975   : > { %1178 = vrot.lane.b32.xlu1 %v2581_v51, %s2806_s9 }
 0x9e5   : > { %v1155_v52 = vpop.permute.xlu0 %1154 }
 0x9e6   : > { %v1157_v53 = vmul.f32 %v2575_v38, %v1155_v52 }
 0x9e7   : > { %v1179_v54 = vpop.permute.xlu1 %1178 }
 0x9e8   : > { %1183 = vrot.lane.b32.xlu0 %v1157_v53, %s2807_s10  ;;  %v1181_v55 = vmul.f32 %v2577_v41, %v1179_v54 }
 0x9ea   : > { %1188 = vrot.lane.b32.xlu1 %v1181_v55, %s2808_s27 }
 0xa5a   : > { %v1184_v1 = vpop.permute.xlu0 %1183 }
 0xa5b   : > { %1186 = vst.msk [vmem:[#allocation3 + $0x10] sm:$0xff] %vm872_vm1, %v1184_v1 }
 0xa5c   : > { %v1189_v2 = vpop.permute.xlu1 %1188 }
 0xa5d   : > { %1191 = vst.msk [vmem:[#allocation3 + $0x28] sm:$0xff] %vm878_vm2, %v1189_v2  ;;  %v1194_v3 = vsel %vm872_vm1, %v1184_v1, %v1189_v2 }
 0xa5e   : > { %v1195_v4 = vpack.c.bf16 %v1194_v3, %v1194_v3 }
 0xa60   : > { %2283 = vmatmul.mubr.msk.bf16.vlgmr.msra.gmra.mxu1 %vm773_vm3, %v1195_v4 }
 0xa61   : > { %1568 = vmatpush1.bf16.msra.mxu1 %v3016_v57  ;;  %1591 = vmatprep.mubr.bf16.mxu1 %v2804_v58 }
 0xa62   : > { %1569 = vmatprep.subr.bf16.mxu1 %v3022_v59 }
 0xa65   : > { %1570 = vmatpush1.bf16.msra.mxu1 %v3027_v60 }
 0xa66   : > { %1571 = vmatprep.subr.bf16.mxu1 %v3032_v61 }
 0xa69   : > { %1572 = vmatpush1.bf16.msra.mxu1 %v3036_v62 }
 0xa6a   : > { %1573 = vmatprep.subr.bf16.mxu1 %v3042_v63 }
 0xa6d   : > { %1574 = vmatpush1.bf16.msra.mxu1 %v3047_v0 }
 0xb20   : > { %v1281_v6 = vpop.f32.mrf.mxu1 }
 0xb21   : > { %v1288_v8 = vadd.f32 %v1281_v6, %v1192_v5 }
 0xb22   : > { %v1283_v9 = vpop.f32.mrf.mxu1 }
 0xb23   : > { %2582 = vtanh.f32 %v1288_v8  ;;  %v1289_v10 = vadd.f32 %v1283_v9, %v1193_v7  ;;  %v2284_v15 = vmul.f32 -1.442695, %v1288_v8 }
 0xb24   : > { %v1285_v11 = vpop.f32.mrf.mxu1 }
 0xb25   : > { %2584 = vtanh.f32 %v1289_v10  ;;  %v2285_v16 = vmul.f32 -1.442695, %v1289_v10 }
 0xb26   : > { %v1286_v12 = vpop.f32.mrf.mxu1  ;;  %2586 = vpow2.f32 %v2284_v15 }
 0xb27   : > { %2588 = vpow2.f32 %v2285_v16 }
 0xb30   : > { %v2583_v13 = vpop.eup %2582 }
 0xb31   : > { %1299 = vrot.lane.b32.xlu0 %v2583_v13, %s2806_s9 }
 0xb32   : > { %v2585_v14 = vpop.eup %2584 }
 0xb33   : > { %1323 = vrot.lane.b32.xlu1 %v2585_v14, %s2806_s9  ;;  %v2587_v17 = vpop.eup %2586 }
 0xb34   : > { %v2589_v18 = vpop.eup %2588  ;;  %v1293_v19 = vadd.f32 1.0, %v2587_v17 }
 0xb35   : > { %v1317_v20 = vadd.f32 1.0, %v2589_v18  ;;  %v1504_v18 = vld [vmem:[#allocation2 + $0x10] sm:$0xff] }
 0xb36   : > { %2590 = vrcp.f32 %v1293_v19 }
 0xb37   : > { %2592 = vrcp.f32 %v1317_v20  ;;  %v1505_v20 = vld [vmem:[#allocation2 + $0x68] sm:$0xff] }
 0xb43   : > { %v2591_v21 = vpop.eup %2590 }
 0xb44   : > { %v2593_v24 = vpop.eup %2592  ;;  %v1297_v27 = vmul.f32 %v2591_v21, %v3126_v46 }
 0xb45   : > { %v1321_v30 = vmul.f32 %v2593_v24, %v1175_v49 }
 0xba3   : > { %v1300_v22 = vpop.permute.xlu0 %1299 }
 0xba4   : > { %v1302_v23 = vmul.f32 %v2591_v21, %v1300_v22 }
 0xba5   : > { %v1324_v25 = vpop.permute.xlu1 %1323 }
 0xba6   : > { %1304 = vrot.lane.b32.xlu0 %v1302_v23, %s2806_s9  ;;  %v1326_v26 = vmul.f32 %v2593_v24, %v1324_v25 }
 0xba8   : > { %1328 = vrot.lane.b32.xlu1 %v1326_v26, %s2806_s9 }
 0xc18   : > { %v1305_v28 = vpop.permute.xlu0 %1304 }
 0xc19   : > { %v3151_v29 = vadd.f32 %v1305_v28, %v1297_v27 }
 0xc1a   : > { %v1329_v31 = vpop.permute.xlu1 %1328 }
 0xc1b   : > { %2594 = vtanh.f32 %v3151_v29  ;;  %v1331_v32 = vadd.f32 %v1329_v31, %v1321_v30 }
 0xc1d   : > { %2596 = vtanh.f32 %v1331_v32 }
 0xc28   : > { %v2595_v33 = vpop.eup %2594 }
 0xc29   : > { %1310 = vrot.lane.b32.xlu0 %v2595_v33, %s2806_s9 }
 0xc2a   : > { %v2597_v34 = vpop.eup %2596 }
 0xc2b   : > { %1334 = vrot.lane.b32.xlu1 %v2597_v34, %s2806_s9 }
 0xc9b   : > { %v1311_v56 = vpop.permute.xlu0 %1310 }
 0xc9c   : > { %v1313_v35 = vmul.f32 %v2591_v21, %v1311_v56 }
 0xc9d   : > { %v1335_v36 = vpop.permute.xlu1 %1334 }
 0xc9e   : > { %1339 = vrot.lane.b32.xlu0 %v1313_v35, %s2807_s10  ;;  %v1337_v37 = vmul.f32 %v2593_v24, %v1335_v36 }
 0xca0   : > { %1344 = vrot.lane.b32.xlu1 %v1337_v37, %s2808_s27 }
 0xd10   : > { %v1340_v38 = vpop.permute.xlu0 %1339 }
 0xd11   : > { %1342 = vst.msk [vmem:[#allocation3 + $0x18] sm:$0xff] %vm872_vm1, %v1340_v38 }
 0xd12   : > { %v1345_v39 = vpop.permute.xlu1 %1344 }
 0xd13   : > { %1347 = vst.msk [vmem:[#allocation3 + $0x20] sm:$0xff] %vm878_vm2, %v1345_v39  ;;  %v1350_v40 = vsel %vm872_vm1, %v1340_v38, %v1345_v39 }
 0xd14   : > { %v1351_v41 = vpack.c.bf16 %v1350_v40, %v1350_v40 }
 0xd16   : > { %2294 = vmatmul.mubr.msk.bf16.vlgmr.msra.gmra.mxu0 %vm773_vm3, %v1351_v41 }
 0xd17   : > { %1724 = vmatpush1.bf16.msra.mxu0 %v3016_v57  ;;  %1747 = vmatprep.mubr.bf16.mxu0 %v2804_v58 }
 0xd18   : > { %1725 = vmatprep.subr.bf16.mxu0 %v3022_v59 }
 0xd1b   : > { %1726 = vmatpush1.bf16.msra.mxu0 %v3027_v60 }
 0xd1c   : > { %1727 = vmatprep.subr.bf16.mxu0 %v3032_v61 }
 0xd1f   : > { %1728 = vmatpush1.bf16.msra.mxu0 %v3036_v62 }
 0xd20   : > { %1729 = vmatprep.subr.bf16.mxu0 %v3042_v63 }
 0xd23   : > { %1730 = vmatpush1.bf16.msra.mxu0 %v3047_v0 }
 0xdd6   : > { %v1437_v43 = vpop.f32.mrf.mxu0 }
 0xdd7   : > { %v1444_v45 = vadd.f32 %v1437_v43, %v1348_v42 }
 0xdd8   : > { %v1439_v46 = vpop.f32.mrf.mxu0 }
 0xdd9   : > { %2598 = vtanh.f32 %v1444_v45  ;;  %v1445_v57 = vadd.f32 %v1439_v46, %v1349_v44  ;;  %v2295_v61 = vmul.f32 -1.442695, %v1444_v45 }
 0xdda   : > { %v1441_v47 = vpop.f32.mrf.mxu0 }
 0xddb   : > { %2600 = vtanh.f32 %v1445_v57  ;;  %v2296_v62 = vmul.f32 -1.442695, %v1445_v57 }
 0xddc   : > { %v1442_v59 = vpop.f32.mrf.mxu0  ;;  %2602 = vpow2.f32 %v2295_v61 }
 0xddd   : > { %2604 = vpow2.f32 %v2296_v62 }
 0xde6   : > { %v2599_v48 = vpop.eup %2598 }
 0xde7   : > { %1455 = vrot.lane.b32.xlu0 %v2599_v48, %s2806_s9 }
 0xde8   : > { %v2601_v60 = vpop.eup %2600 }
 0xde9   : > { %1479 = vrot.lane.b32.xlu1 %v2601_v60, %s2806_s9  ;;  %v2603_v63 = vpop.eup %2602 }
 0xdea   : > { %v2605_v0 = vpop.eup %2604  ;;  %v1449_v49 = vadd.f32 1.0, %v2603_v63  ;;  %v1660_v63 = vld [vmem:[#allocation2 + $0x60] sm:$0xff] }
 0xdeb   : > { %v1473_v50 = vadd.f32 1.0, %v2605_v0 }
 0xdec   : > { %2606 = vrcp.f32 %v1449_v49  ;;  %v1661_v49 = vld [vmem:[#allocation2 + $0x18] sm:$0xff] }
 0xded   : > { %2608 = vrcp.f32 %v1473_v50 }
 0xdf9   : > { %v2607_v51 = vpop.eup %2606 }
 0xdfa   : > { %v2609_v54 = vpop.eup %2608  ;;  %v1453_v2 = vmul.f32 %v2607_v51, %v3151_v29 }
 0xdfb   : > { %v1477_v5 = vmul.f32 %v2609_v54, %v1331_v32 }
 0xe59   : > { %v1456_v52 = vpop.permute.xlu0 %1455 }
 0xe5a   : > { %v1458_v53 = vmul.f32 %v2607_v51, %v1456_v52 }
 0xe5b   : > { %v1480_v55 = vpop.permute.xlu1 %1479 }
 0xe5c   : > { %1460 = vrot.lane.b32.xlu0 %v1458_v53, %s2806_s9  ;;  %v1482_v1 = vmul.f32 %v2609_v54, %v1480_v55 }
 0xe5e   : > { %1484 = vrot.lane.b32.xlu1 %v1482_v1, %s2806_s9 }
 0xece   : > { %v1461_v3 = vpop.permute.xlu0 %1460 }
 0xecf   : > { %v1463_v4 = vadd.f32 %v1461_v3, %v1453_v2 }
 0xed0   : > { %v1485_v6 = vpop.permute.xlu1 %1484 }
 0xed1   : > { %2610 = vtanh.f32 %v1463_v4  ;;  %v1487_v7 = vadd.f32 %v1485_v6, %v1477_v5 }
 0xed3   : > { %2612 = vtanh.f32 %v1487_v7 }
 0xede   : > { %v2611_v8 = vpop.eup %2610 }
 0xedf   : > { %1466 = vrot.lane.b32.xlu0 %v2611_v8, %s2806_s9 }
 0xee0   : > { %v2613_v9 = vpop.eup %2612 }
 0xee1   : > { %1490 = vrot.lane.b32.xlu1 %v2613_v9, %s2806_s9 }
 0xf51   : > { %v1467_v10 = vpop.permute.xlu0 %1466 }
 0xf52   : > { %v1469_v11 = vmul.f32 %v2607_v51, %v1467_v10 }
 0xf53   : > { %v1491_v12 = vpop.permute.xlu1 %1490 }
 0xf54   : > { %1495 = vrot.lane.b32.xlu0 %v1469_v11, %s2807_s10  ;;  %v1493_v13 = vmul.f32 %v2609_v54, %v1491_v12 }
 0xf56   : > { %1500 = vrot.lane.b32.xlu1 %v1493_v13, %s2808_s27 }
 0xfc6   : > { %v1496_v14 = vpop.permute.xlu0 %1495 }
 0xfc7   : > { %1498 = vst.msk [vmem:[#allocation3 + $0x20] sm:$0xff] %vm872_vm1, %v1496_v14 }
 0xfc8   : > { %v1501_v15 = vpop.permute.xlu1 %1500 }
 0xfc9   : > { %1503 = vst.msk [vmem:[#allocation3 + $0x18] sm:$0xff] %vm878_vm2, %v1501_v15  ;;  %v1506_v16 = vsel %vm872_vm1, %v1496_v14, %v1501_v15 }
 0xfca   : > { %v1507_v17 = vpack.c.bf16 %v1506_v16, %v1506_v16 }
 0xfcc   : > { %2305 = vmatmul.mubr.msk.bf16.vlgmr.msra.gmra.mxu1 %vm773_vm3, %v1507_v17 }
 0xfcd   : > { %1903 = vmatprep.mubr.bf16.mxu1 %v2804_v58 }
0x108c   : > { %v1593_v19 = vpop.f32.mrf.mxu1 }
0x108d   : > { %v1600_v21 = vadd.f32 %v1593_v19, %v1504_v18 }
0x108e   : > { %v1595_v22 = vpop.f32.mrf.mxu1 }
0x108f   : > { %2614 = vtanh.f32 %v1600_v21  ;;  %v1601_v23 = vadd.f32 %v1595_v22, %v1505_v20  ;;  %v2306_v28 = vmul.f32 -1.442695, %v1600_v21  ;;  %v2522_v20 = vld [vmem:[%s2964_s11 + $0x30] ss:$8 sps:$4 sm:$0xff]   ;;  %v2524_v21 = vld [vmem:[%s2964_s11 + $0x34] ss:$8 sps:$4 sm:$0xff]  }
0x1090   : > { %v1597_v24 = vpop.f32.mrf.mxu1  ;;  %v2527_v22 = vld [vmem:[%s2964_s11 + $0x24] ss:$8 sps:$4 sm:$0xff]   ;;  %1879 = vmatprep.subr.bf16.mxu1 %v2524_v21 }
0x1091   : > { %2616 = vtanh.f32 %v1601_v23  ;;  %v2307_v29 = vmul.f32 -1.442695, %v1601_v23  ;;  %1880 = vmatpush1.bf16.msra.mxu1 %v2522_v20  ;;  %v2525_v23 = vld [vmem:[%s2964_s11 + $0x20] ss:$8 sps:$4 sm:$0xff]   ;;  %v2530_v24 = vld [vmem:[%s2964_s11 + $0x14] ss:$8 sps:$4 sm:$0xff]  }
0x1092   : > { %v1598_v25 = vpop.f32.mrf.mxu1  ;;  %2618 = vpow2.f32 %v2306_v28  ;;  %1881 = vmatprep.subr.bf16.mxu1 %v2527_v22  ;;  %v2531_v28 = vld [vmem:[%s2964_s11] ss:$8 sps:$4 sm:$0xff]  }
0x1093   : > { %2620 = vpow2.f32 %v2307_v29  ;;  %v2533_v29 = vld [vmem:[%s2964_s11 + $0x4] ss:$8 sps:$4 sm:$0xff]  }
0x1095   : > { %1882 = vmatpush1.bf16.msra.mxu1 %v2525_v23 }
0x1096   : > { %1883 = vmatprep.subr.bf16.mxu1 %v2530_v24 }
0x109c   : > { %v2615_v26 = vpop.eup %2614 }
0x109d   : > { %1611 = vrot.lane.b32.xlu0 %v2615_v26, %s2806_s9  ;;  %v2528_v26 = vld [vmem:[%s2964_s11 + $0x10] ss:$8 sps:$4 sm:$0xff]  }
0x109e   : > { %v2617_v27 = vpop.eup %2616  ;;  %1884 = vmatpush1.bf16.msra.mxu1 %v2528_v26 }
0x109f   : > { %1635 = vrot.lane.b32.xlu1 %v2617_v27, %s2806_s9  ;;  %v2619_v58 = vpop.eup %2618  ;;  %1885 = vmatprep.subr.bf16.mxu1 %v2533_v29 }
0x10a0   : > { %v2621_v30 = vpop.eup %2620  ;;  %v1605_v31 = vadd.f32 1.0, %v2619_v58 }
0x10a1   : > { %v1629_v32 = vadd.f32 1.0, %v2621_v30 }
0x10a2   : > { %2622 = vrcp.f32 %v1605_v31  ;;  %1886 = vmatpush1.bf16.msra.mxu1 %v2531_v28 }
0x10a3   : > { %2624 = vrcp.f32 %v1629_v32 }
0x10af   : > { %v2623_v33 = vpop.eup %2622 }
0x10b0   : > { %v2625_v35 = vpop.eup %2624  ;;  %v1609_v38 = vmul.f32 %v2623_v33, %v1463_v4 }
0x10b1   : > { %v1633_v41 = vmul.f32 %v2625_v35, %v1487_v7 }
0x110f   : > { %v1612_v34 = vpop.permute.xlu0 %1611 }
0x1110   : > { %v1614_v56 = vmul.f32 %v2623_v33, %v1612_v34 }
0x1111   : > { %v1636_v36 = vpop.permute.xlu1 %1635 }
0x1112   : > { %1616 = vrot.lane.b32.xlu0 %v1614_v56, %s2806_s9  ;;  %v1638_v37 = vmul.f32 %v2625_v35, %v1636_v36  ;;  %v1816_v36 = vld [vmem:[#allocation2 + $0x78] sm:$0xff] }
0x1114   : > { %1640 = vrot.lane.b32.xlu1 %v1638_v37, %s2806_s9 }
0x1184   : > { %v1617_v39 = vpop.permute.xlu0 %1616 }
0x1185   : > { %v1619_v40 = vadd.f32 %v1617_v39, %v1609_v38  ;;  %v1817_v38 = vld [vmem:[#allocation2] sm:$0xff] }
0x1186   : > { %v1641_v42 = vpop.permute.xlu1 %1640 }
0x1187   : > { %2626 = vtanh.f32 %v1619_v40  ;;  %v1643_v43 = vadd.f32 %v1641_v42, %v1633_v41 }
0x1189   : > { %2628 = vtanh.f32 %v1643_v43 }
0x1194   : > { %v2627_v44 = vpop.eup %2626 }
0x1195   : > { %1622 = vrot.lane.b32.xlu0 %v2627_v44, %s2806_s9 }
0x1196   : > { %v2629_v45 = vpop.eup %2628 }
0x1197   : > { %1646 = vrot.lane.b32.xlu1 %v2629_v45, %s2806_s9 }
0x1207   : > { %v1623_v46 = vpop.permute.xlu0 %1622 }
0x1208   : > { %v1625_v57 = vmul.f32 %v2623_v33, %v1623_v46 }
0x1209   : > { %v1647_v47 = vpop.permute.xlu1 %1646 }
0x120a   : > { %1651 = vrot.lane.b32.xlu0 %v1625_v57, %s2807_s10  ;;  %v1649_v59 = vmul.f32 %v2625_v35, %v1647_v47 }
0x120c   : > { %1656 = vrot.lane.b32.xlu1 %v1649_v59, %s2808_s27 }
0x127c   : > { %v1652_v48 = vpop.permute.xlu0 %1651 }
0x127d   : > { %1654 = vst.msk [vmem:[#allocation3 + $0x28] sm:$0xff] %vm872_vm1, %v1652_v48 }
0x127e   : > { %v1657_v60 = vpop.permute.xlu1 %1656 }
0x127f   : > { %1659 = vst.msk [vmem:[#allocation3 + $0x10] sm:$0xff] %vm878_vm2, %v1657_v60  ;;  %v1662_v61 = vsel %vm872_vm1, %v1652_v48, %v1657_v60 }
0x1280   : > { %v1663_v62 = vpack.c.bf16 %v1662_v61, %v1662_v61 }
0x1282   : > { %2316 = vmatmul.mubr.msk.bf16.vlgmr.msra.gmra.mxu0 %vm773_vm3, %v1663_v62 }
0x1342   : > { %v1749_v0 = vpop.f32.mrf.mxu0 }
0x1343   : > { %v1756_v50 = vadd.f32 %v1749_v0, %v1660_v63 }
0x1344   : > { %v1751_v51 = vpop.f32.mrf.mxu0 }
0x1345   : > { %2630 = vtanh.f32 %v1756_v50  ;;  %v1757_v52 = vadd.f32 %v1751_v51, %v1661_v49  ;;  %v2317_v2 = vmul.f32 -1.442695, %v1756_v50 }
0x1346   : > { %v1753_v53 = vpop.f32.mrf.mxu0 }
0x1347   : > { %2632 = vtanh.f32 %v1757_v52  ;;  %v2318_v3 = vmul.f32 -1.442695, %v1757_v52 }
0x1348   : > { %v1754_v54 = vpop.f32.mrf.mxu0  ;;  %2634 = vpow2.f32 %v2317_v2 }
0x1349   : > { %2636 = vpow2.f32 %v2318_v3 }
0x1352   : > { %v2631_v55 = vpop.eup %2630 }
0x1353   : > { %1767 = vrot.lane.b32.xlu0 %v2631_v55, %s2806_s9 }
0x1354   : > { %v2633_v1 = vpop.eup %2632 }
0x1355   : > { %1791 = vrot.lane.b32.xlu1 %v2633_v1, %s2806_s9  ;;  %v2635_v4 = vpop.eup %2634 }
0x1356   : > { %v2637_v5 = vpop.eup %2636  ;;  %v1761_v6 = vadd.f32 1.0, %v2635_v4 }
0x1357   : > { %v1785_v7 = vadd.f32 1.0, %v2637_v5 }
0x1358   : > { %2638 = vrcp.f32 %v1761_v6 }
0x1359   : > { %2640 = vrcp.f32 %v1785_v7 }
0x1365   : > { %v2639_v8 = vpop.eup %2638 }
0x1366   : > { %v2641_v11 = vpop.eup %2640  ;;  %v1765_v14 = vmul.f32 %v2639_v8, %v1619_v40 }
0x1367   : > { %v1789_v17 = vmul.f32 %v2641_v11, %v1643_v43 }
0x13c5   : > { %v1768_v9 = vpop.permute.xlu0 %1767 }
0x13c6   : > { %v1770_v10 = vmul.f32 %v2639_v8, %v1768_v9 }
0x13c7   : > { %v1792_v12 = vpop.permute.xlu1 %1791 }
0x13c8   : > { %1772 = vrot.lane.b32.xlu0 %v1770_v10, %s2806_s9  ;;  %v1794_v13 = vmul.f32 %v2641_v11, %v1792_v12 }
0x13ca   : > { %1796 = vrot.lane.b32.xlu1 %v1794_v13, %s2806_s9 }
0x143a   : > { %v1773_v15 = vpop.permute.xlu0 %1772 }
0x143b   : > { %v3200_v16 = vadd.f32 %v1773_v15, %v1765_v14 }
0x143c   : > { %v1797_v18 = vpop.permute.xlu1 %1796 }
0x143d   : > { %2642 = vtanh.f32 %v3200_v16  ;;  %v3203_v19 = vadd.f32 %v1797_v18, %v1789_v17 }
0x143f   : > { %2644 = vtanh.f32 %v3203_v19 }
0x144a   : > { %v2643_v25 = vpop.eup %2642 }
0x144b   : > { %1778 = vrot.lane.b32.xlu0 %v2643_v25, %s2806_s9 }
0x144c   : > { %v2645_v27 = vpop.eup %2644 }
0x144d   : > { %1802 = vrot.lane.b32.xlu1 %v2645_v27, %s2806_s9 }
0x14bd   : > { %v1779_v58 = vpop.permute.xlu0 %1778 }
0x14be   : > { %v1781_v30 = vmul.f32 %v2639_v8, %v1779_v58 }
0x14bf   : > { %v1803_v31 = vpop.permute.xlu1 %1802 }
0x14c0   : > { %1807 = vrot.lane.b32.xlu0 %v1781_v30, %s2807_s10  ;;  %v1805_v32 = vmul.f32 %v2641_v11, %v1803_v31 }
0x14c2   : > { %1812 = vrot.lane.b32.xlu1 %v1805_v32, %s2808_s27 }
0x1532   : > { %v1808_v33 = vpop.permute.xlu0 %1807 }
0x1533   : > { %1810 = vst.msk [vmem:[#allocation3 + $0x30] sm:$0xff] %vm872_vm1, %v1808_v33 }
0x1534   : > { %v1813_v34 = vpop.permute.xlu1 %1812 }
0x1535   : > { %1815 = vst.msk [vmem:[#allocation3 + $0x8] sm:$0xff] %vm878_vm2, %v1813_v34  ;;  %v1818_v56 = vsel %vm872_vm1, %v1808_v33, %v1813_v34 }
0x1536   : > { %v1819_v35 = vpack.c.bf16 %v1818_v56, %v1818_v56 }
0x1538   : > { %2327 = vmatmul.mubr.msk.bf16.vlgmr.msra.gmra.mxu1 %vm773_vm3, %v1819_v35 }
0x15f8   : > { %v1905_v37 = vpop.f32.mrf.mxu1 }
0x15f9   : > { %v1912_v39 = vadd.f32 %v1905_v37, %v1816_v36 }
0x15fa   : > { %v1907_v40 = vpop.f32.mrf.mxu1 }
0x15fb   : > { %2646 = vtanh.f32 %v1912_v39  ;;  %v1913_v41 = vadd.f32 %v1907_v40, %v1817_v38  ;;  %v2328_v46 = vmul.f32 -1.442695, %v1912_v39 }
0x15fc   : > { %v1909_v42 = vpop.f32.mrf.mxu1 }
0x15fd   : > { %2648 = vtanh.f32 %v1913_v41  ;;  %v2329_v57 = vmul.f32 -1.442695, %v1913_v41 }
0x15fe   : > { %v1910_v43 = vpop.f32.mrf.mxu1  ;;  %2650 = vpow2.f32 %v2328_v46 }
0x15ff   : > { %2652 = vpow2.f32 %v2329_v57 }
0x1608   : > { %v2647_v44 = vpop.eup %2646 }
0x1609   : > { %1923 = vrot.lane.b32.xlu0 %v2647_v44, %s2806_s9 }
0x160a   : > { %v2649_v45 = vpop.eup %2648 }
0x160b   : > { %1947 = vrot.lane.b32.xlu1 %v2649_v45, %s2806_s9  ;;  %v2651_v47 = vpop.eup %2650 }
0x160c   : > { %v2653_v59 = vpop.eup %2652  ;;  %v1917_v48 = vadd.f32 1.0, %v2651_v47 }
0x160d   : > { %v1941_v60 = vadd.f32 1.0, %v2653_v59 }
0x160e   : > { %2654 = vrcp.f32 %v1917_v48 }
0x160f   : > { %2656 = vrcp.f32 %v1941_v60 }
0x161b   : > { %v2655_v61 = vpop.eup %2654 }
0x161c   : > { %v2657_v0 = vpop.eup %2656  ;;  %v1921_v51 = vmul.f32 %v2655_v61, %v3200_v16 }
0x161d   : > { %v1945_v54 = vmul.f32 %v2657_v0, %v3203_v19 }
0x167b   : > { %v1924_v62 = vpop.permute.xlu0 %1923 }
0x167c   : > { %v1926_v63 = vmul.f32 %v2655_v61, %v1924_v62 }
0x167d   : > { %v1948_v49 = vpop.permute.xlu1 %1947 }
0x167e   : > { %1928 = vrot.lane.b32.xlu0 %v1926_v63, %s2806_s9  ;;  %v1950_v50 = vmul.f32 %v2657_v0, %v1948_v49 }
0x1680   : > { %1952 = vrot.lane.b32.xlu1 %v1950_v50, %s2806_s9 }
0x16f0   : > { %v1929_v52 = vpop.permute.xlu0 %1928 }
0x16f1   : > { %v1931_v53 = vadd.f32 %v1929_v52, %v1921_v51 }
0x16f2   : > { %v1953_v55 = vpop.permute.xlu1 %1952 }
0x16f3   : > { %2658 = vtanh.f32 %v1931_v53  ;;  %v1955_v1 = vadd.f32 %v1953_v55, %v1945_v54 }
0x16f5   : > { %2660 = vtanh.f32 %v1955_v1 }
0x1700   : > { %v2659_v2 = vpop.eup %2658 }
0x1701   : > { %1934 = vrot.lane.b32.xlu0 %v2659_v2, %s2806_s9 }
0x1702   : > { %v2661_v3 = vpop.eup %2660 }
0x1703   : > { %1958 = vrot.lane.b32.xlu1 %v2661_v3, %s2806_s9 }
0x1773   : > { %v1935_v4 = vpop.permute.xlu0 %1934 }
0x1774   : > { %v1937_v5 = vmul.f32 %v2655_v61, %v1935_v4 }
0x1775   : > { %v1959_v6 = vpop.permute.xlu1 %1958 }
0x1776   : > { %1963 = vrot.lane.b32.xlu0 %v1937_v5, %s2807_s10  ;;  %v1961_v7 = vmul.f32 %v2657_v0, %v1959_v6 }
0x1778   : > { %1968 = vrot.lane.b32.xlu1 %v1961_v7, %s2808_s27 }
0x17e7   : > { %1975 = sbr.rel (%p2330_p7) target bundleno = 6753 (0x1a61), region = 64 }
0x17e8   : > { %v1964_v8 = vpop.permute.xlu0 %1963 }
0x17e9   : > { %1966 = vst.msk [vmem:[#allocation3 + $0x38] sm:$0xff] %vm872_vm1, %v1964_v8 }
0x17ea   : > { %v1969_v9 = vpop.permute.xlu1 %1968 }
0x17eb   : > { %1971 = vst.msk [vmem:[#allocation3] sm:$0xff] %vm878_vm2, %v1969_v9 }
0x17ec   : > { %v2662_v11 = vld [vmem:[#allocation7 + $0x38] sm:$0xff]   ;;  %v2810_v12 = vmov 0.0   ;;  %v2663_v13 = vld [vmem:[#allocation7 + $0x30] sm:$0xff]   ;;  %vm2811_vm4 = vmmov 0   ;;  %v2664_v14 = vld [vmem:[#allocation7 + $0x28] sm:$0xff]  }
0x17ed   : > { %2355 = vmatprep.subr.bf16.mxu0 %v2810_v12  ;;  %2371 = vmatprep.mubr.msk.bf16.mxu0 %vm2811_vm4, %v2810_v12  ;;  %v2665_v15 = vld [vmem:[#allocation7 + $0x20] sm:$0xff]   ;;  %v2666_v16 = vld [vmem:[#allocation7 + $0x18] sm:$0xff]   ;;  %v2667_v17 = vld [vmem:[#allocation7 + $0x10] sm:$0xff]  }
0x17ee   : > { %2356 = vmatpush3.bf16.msra.mxu0 %v2662_v11  ;;  %v2668_v18 = vld [vmem:[#allocation7 + $0x8] sm:$0xff]   ;;  %v2669_v19 = vld [vmem:[#allocation7] sm:$0xff]  }
0x17ef   : > { %2357 = vmatprep.subr.bf16.mxu0 %v2810_v12  ;;  %v2331_v24 = vld [vmem:[%s3269_s5] ss:$0 sm:$0xff] }
0x17f0   : > { %v1977_v10 = vld [vmem:[#allocation3 + $0x38] sm:$0xff] }
0x17f1   : > { %1979 = vrot.lane.b32.xlu0 %v1977_v10, %s2809_s21 }
0x17f2   : > { %2358 = vmatpush3.bf16.msra.mxu0 %v2663_v13  ;;  %v1976_v20 = vld [vmem:[#allocation3] sm:$0xff] }
0x17f3   : > { %2359 = vmatprep.subr.bf16.mxu0 %v2810_v12 }
0x17f6   : > { %2360 = vmatpush3.bf16.msra.mxu0 %v2664_v14 }
0x17f7   : > { %2361 = vmatprep.subr.bf16.mxu0 %v2810_v12 }
0x17fa   : > { %2362 = vmatpush3.bf16.msra.mxu0 %v2665_v15 }
0x17fb   : > { %2363 = vmatprep.subr.bf16.mxu0 %v2810_v12 }
0x17fe   : > { %2364 = vmatpush3.bf16.msra.mxu0 %v2666_v16 }
0x17ff   : > { %2365 = vmatprep.subr.bf16.mxu0 %v2810_v12 }
0x1802   : > { %2366 = vmatpush3.bf16.msra.mxu0 %v2667_v17 }
0x1803   : > { %2367 = vmatprep.subr.bf16.mxu0 %v2810_v12 }
0x1806   : > { %2368 = vmatpush3.bf16.msra.mxu0 %v2668_v18 }
0x1807   : > { %2369 = vmatprep.subr.bf16.mxu0 %v2810_v12 }
0x180a   : > { %2370 = vmatpush3.bf16.msra.mxu0 %v2669_v19 }
0x1863   : > { %v1980_v21 = vpop.permute.xlu0 %1979 }
0x1864   : > { %v1982_v22 = vsel %vm773_vm3, %v1976_v20, %v1980_v21 }
0x1865   : > { %v1983_v23 = vpack.c.bf16 %v1982_v22, %v1982_v22 }
0x1867   : > { %2372 = vmatmul.mubr.bf16.vlgmr.msra.gmra.mxu0 %v1983_v23 }
0x1927   : > { %v2089_v25 = vpop.f32.mrf.mxu0 }
0x1928   : > { %v2090_v26 = vadd.f32 %v2331_v24, %v2089_v25 }
0x1929   : > { %v2373_v27 = vpop.f32.mrf.mxu0 }
0x192a   : > { %2095 = vmax.xlane.f32.xlu0 %v2090_v26 }
0x192b   : > { %v2092_v28 = vpop.f32.mrf.mxu0 }
0x192d   : > { %v2374_v29 = vpop.f32.mrf.mxu0 }
0x19b3   : > { %v2096_v58 = vpop.xlane.xlu0 %2095 }
0x19b4   : > { %v2097_v30 = vsub.f32 %v2090_v26, %v2096_v58 }
0x19b6   : > { %v2098_v31 = vmul.f32 1.442695, %v2097_v30 }
0x19b8   : > { %2670 = vpow2.f32 %v2098_v31 }
0x19c5   : > { %v2671_v32 = vpop.eup %2670 }
0x19c6   : > { %2100 = vadd.xlane.f32.xlu1 %v2671_v32 }
0x1a4f   : > { %v2101_v33 = vpop.xlane.xlu1 %2100 }
0x1a50   : > { %2672 = vrcp.f32 %v2101_v33 }
0x1a5d   : > { %v2673_v34 = vpop.eup %2672 }
0x1a5e   : > { %v2103_v56 = vmul.f32 %v2673_v34, %v2671_v32 }
0x1a60   : > { %2104 = vst [vmem:[#allocation9] sm:$0xff] %v2103_v56 }
0x1a61 PF: > { %p2420_p9 = scmp.eq.s32.totalorder %s2867_s25, 1  ;;  %s2812_s8 = smov [#allocation9]  }
0x1a62   : > { %s2112_s11 = sshll.u32 %s2812_s8, 4  ;;  %s2113_s11 = int_to_ptr.vmem [resolvable:$true] %s2112_s11 }
0x1a63   : > { %s2728_s12 = scalar_lea.vmem %s2113_s11, 128  ;;  %p2735_p13 = scmp.lt.s32.totalorder %s2113_s11, %s2113_s11 }
0x1a64   : > { %p2729_p10 = scmp.ne.s32.totalorder %s2113_s11, %s2728_s12  ;;  %p2736_p2 = scmp.lt.s32.totalorder %s2728_s12, %s2728_s12 }
0x1a66   : > { %p2730_p11 = pnand %p2729_p10, %p2420_p9  ;;  %p2737_p0 = por %p2736_p2, %p2735_p13 }
0x1a68   : > { %p2731_p12 = pneg %p2730_p11 }
0x1a6a   : > { %p2738_p1 = pnand %p2737_p0, %p2731_p12 }
0x1a6c   : > { %2741 = shalt.err (!%p2738_p1)
}
0x1a6d   : > { %2406 = dma.vmem_to_hbm [thread:$0]  (%p2420_p9), %s2113_s11, 128, %s3270_s6, [#allocation6]  }
0x1a6e   : > { %2777 = dma.done.wait (%p2420_p9), [#allocation6], 128  }
0x1a6f   : > { %2779 = vsyncadd (%p2420_p9), [#allocation6], 4294967168 }
0x1a70 PF: > { %p18_p4 = scmp.ge.s32.totalorder %s2893_s7, 4   ;;  %s3283_s21 = smov %s2786_s22 }
0x1a71   : > { %s3284_s22 = smov %s2790_s23  ;;  %s3285_s23 = smov %s2910_s15 }
0x1a72   : > { %s3286_s24 = smov %s2893_s7  ;;  %20 = sbr.rel (!%p18_p4) target bundleno = 5 (0x5), region = 103 }
0x1a77   :  { %2125 = vsyncpa [#allocation5], 1 }
0x1a78   :  { %2127 = vsyncpa [#allocation5 + $0x1], 1 }
0x1a79   :  { %2128 = vsyncpa [#allocation8], 1 }
0x1a7a   :  { %2129 = vsyncpa [#allocation6], 1 }
0x1a7b   :  { %2131 = vsyncpa [#allocation6 + $0x1], 1 }

</bundles_post_ra>
